<compile_context>
chip_gen: v7x
topology: tpu7x:2x2x1
jax: 0.10.0
libtpu: 0.0.40
codegen_flags: <defaults>
</compile_context>

<pallas_src>
import numpy as np
import jax
import jax.numpy as jnp
from jax.experimental import pallas as pl
from jax.experimental.pallas import tpu as pltpu  # noqa: F401


# ------------------------------ fused kernel ---------------------------------

def _make_fused_kernel(*, S, B, H, num_layers):
    """Build the fused (LSTM stack + linear head) kernel for static S, B, H, L.

    Expects per-layer weights with gate columns reordered to (i, f, o, g) and the
    i/f/o columns (and biases) pre-scaled by 0.5, so each cell needs exactly ONE
    tanh over the full (B, 4H) pre-activation slab plus one tanh(c).
    """

    def _cell(pre, c):
        # pre: (B, 4H) = half-scaled i/f/o pre-activations | unscaled g pre-activation
        t = jnp.tanh(pre)                                   # ONE EUP push for all 4 gates
        ifo = 0.5 * (t[:, : 3 * H] + 1.0)                   # = sigmoid of the original i/f/o
        i_g = ifo[:, 0 * H:1 * H]
        f_g = ifo[:, 1 * H:2 * H]
        o_g = ifo[:, 2 * H:3 * H]
        g_g = t[:, 3 * H:]
        c_new = f_g * c + i_g * g_g
        h_new = o_g * jnp.tanh(c_new)
        return h_new, c_new

    def kernel(*refs):
        # arg order: x, (wih, whh, b) * L, lin_w, lin_b, out
        x_ref = refs[0]
        lw_ref = refs[1 + 3 * num_layers]                   # (1, H)
        lb_ref = refs[2 + 3 * num_layers]                   # (1, 1)
        o_ref = refs[3 + 3 * num_layers]                    # (B, 1)

        wih = [refs[1 + 3 * l][...] for l in range(num_layers)]    # (F_in, 4H)
        whh = [refs[2 + 3 * l][...] for l in range(num_layers)]    # (H,    4H)
        bias = [refs[3 + 3 * l][...] for l in range(num_layers)]   # (1,    4H)

        xs = x_ref[...]                                     # (S*B, F_in), time-major

        # Hoisted layer-0 input projection + fused bias: one matmul, off the serial chain.
        gx0 = jnp.dot(xs, wih[0], preferred_element_type=jnp.float32) + bias[0]
        # Per-step row extraction emitted up-front (h-independent -> hideable).
        gx0_rows = [gx0[t * B:(t + 1) * B] for t in range(S)]

        h = [jnp.zeros((B, H), jnp.float32) for _ in range(num_layers)]
        c = [jnp.zeros((B, H), jnp.float32) for _ in range(num_layers)]

        # Fully unrolled, wavefront-ordered recurrence. Layer-l step t only needs
        # h[l-1] at step t and h[l] at step t-1, and all state stays in vregs
        # (no VMEM scratch round-trip), so the dependent chain is ~S + L - 1 cells.
        for t in range(S):
            pre0 = gx0_rows[t] + jnp.dot(h[0], whh[0],
                                         preferred_element_type=jnp.float32)
            h[0], c[0] = _cell(pre0, c[0])
            for l in range(1, num_layers):
                pre = (jnp.dot(h[l - 1], wih[l], preferred_element_type=jnp.float32)
                       + bias[l]
                       + jnp.dot(h[l], whh[l], preferred_element_type=jnp.float32))
                h[l], c[l] = _cell(pre, c[l])

        # Linear(20, 1) + Sigmoid on the top layer's last hidden state, evaluated as a
        # VPU broadcast-multiply + lane reduction (no trailing MXU push/drain).
        logit = jnp.sum(h[-1] * lw_ref[...], axis=-1, keepdims=True) + lb_ref[...]
        o_ref[...] = jax.nn.sigmoid(logit)

    return kernel


# ------------------------------ full forward ---------------------------------

def _pack_gates(w, H):
    """Repack (…, 4H) gate columns (i,f,g,o) -> (i,f,o,g) and pre-scale i/f/o by 0.5
    so sigmoid(a) can be computed as 0.5*(1 + tanh(a/2)) inside the kernel."""
    i, f, g, o = (w[:, k * H:(k + 1) * H] for k in range(4))
    return jnp.concatenate([0.5 * i, 0.5 * f, 0.5 * o, g], axis=1)


def _rnn_forward(x, lstm_params, lin_w_t, lin_b):
    """x: (batch, seq, input_size) with batch_first=True (PyTorch convention)."""
    B, S, F = x.shape
    H = lstm_params[0][1].shape[0]
    L = len(lstm_params)

    # time-major flatten: (S*B, F) so the hoisted layer-0 input projection is one matmul
    xs = jnp.transpose(x, (1, 0, 2)).reshape(S * B, F)

    flat_params = []
    for (wih_t, whh_t, b) in lstm_params:
        flat_params += [_pack_gates(wih_t, H), _pack_gates(whh_t, H), _pack_gates(b, H)]

    y = pl.pallas_call(
        _make_fused_kernel(S=S, B=B, H=H, num_layers=L),
        out_shape=jax.ShapeDtypeStruct((B, 1), jnp.float32),
    )(xs, *flat_params, lin_w_t.reshape(1, H), lin_b)

    return y.reshape(1, 1, 1)                               # .view(1, 1, 1) (requires B == 1)


rnn_forward = jax.jit(_rnn_forward)


# ------------------------- parameter init (PyTorch-like) ---------------------

def init_params(key, input_size, hidden_size, num_layers):
    """Returns params in plain PyTorch layout: gate order (i,f,g,o), W transposed, bias fused."""
    lstm_params = []
    k = 1.0 / np.sqrt(hidden_size)
    for layer in range(num_layers):
        in_f = input_size if layer == 0 else hidden_size
        key, k1, k2, k3, k4 = jax.random.split(key, 5)
        wih = jax.random.uniform(k1, (4 * hidden_size, in_f), jnp.float32, -k, k)
        whh = jax.random.uniform(k2, (4 * hidden_size, hidden_size), jnp.float32, -k, k)
        bih = jax.random.uniform(k3, (4 * hidden_size,), jnp.float32, -k, k)
        bhh = jax.random.uniform(k4, (4 * hidden_size,), jnp.float32, -k, k)
        lstm_params.append((wih.T, whh.T, (bih + bhh)[None, :]))

    kl = 1.0 / np.sqrt(20.0)
    key, k5, k6 = jax.random.split(key, 3)
    lin_w = jax.random.uniform(k5, (1, 20), jnp.float32, -kl, kl)   # torch Linear(20, 1).weight
    lin_b = jax.random.uniform(k6, (1,), jnp.float32, -kl, kl)
    return lstm_params, lin_w.T, lin_b[None, :]


# ------------------------------ pure-JAX reference ----------------------------

def rnn_ref(x, lstm_params, lin_w_t, lin_b):
    xs = jnp.transpose(x, (1, 0, 2))
    for (wih_t, whh_t, b) in lstm_params:
        H = whh_t.shape[0]
        B = xs.shape[1]

        def step(carry, x_t):
            h, c = carry
            gates = x_t @ wih_t + h @ whh_t + b
            i = jax.nn.sigmoid(gates[:, 0 * H:1 * H])
            f = jax.nn.sigmoid(gates[:, 1 * H:2 * H])
            g = jnp.tanh(gates[:, 2 * H:3 * H])
            o = jax.nn.sigmoid(gates[:, 3 * H:4 * H])
            c = f * c + i * g
            h = o * jnp.tanh(c)
            return (h, c), h

        (_, _), ys = jax.lax.scan(
            step, (jnp.zeros((B, H), jnp.float32), jnp.zeros((B, H), jnp.float32)), xs)
        xs = ys
    h_last = xs[-1]
    return jax.nn.sigmoid(h_last @ lin_w_t + lin_b).reshape(1, 1, 1)


# ---------------------------------- main --------------------------------------

if __name__ == "__main__":
    input_size, hidden_size, num_layers = 8, 20, 2   # hidden=20 forced by Linear(20, 1)
    batch, seq = 1, 8                                # batch=1 forced by .view(1, 1, 1)

    key = jax.random.PRNGKey(0)
    key, kx, kp = jax.random.split(key, 3)
    x = jax.random.normal(kx, (batch, seq, input_size), dtype=jnp.float32)

    lstm_params, lin_w_t, lin_b = init_params(kp, input_size, hidden_size, num_layers)

    out = jax.block_until_ready(rnn_forward(x, lstm_params, lin_w_t, lin_b))
    ref = jax.block_until_ready(rnn_ref(x, lstm_params, lin_w_t, lin_b))

    np.testing.assert_allclose(np.asarray(out), np.asarray(ref), rtol=1e-5, atol=1e-5)
    assert out.shape == (1, 1, 1)

    print("KERNEL_OK")
</pallas_src>

<mosaic_0001>
module attributes {stable_mosaic.version = 11 : i64} {
  func.func @kernel(%arg0: memref<8x8xf32, #tpu.memory_space<vmem>>, %arg1: memref<8x80xf32, #tpu.memory_space<vmem>>, %arg2: memref<20x80xf32, #tpu.memory_space<vmem>>, %arg3: memref<1x80xf32, #tpu.memory_space<vmem>>, %arg4: memref<20x80xf32, #tpu.memory_space<vmem>>, %arg5: memref<20x80xf32, #tpu.memory_space<vmem>>, %arg6: memref<1x80xf32, #tpu.memory_space<vmem>>, %arg7: memref<1x20xf32, #tpu.memory_space<vmem>>, %arg8: memref<1x1xf32, #tpu.memory_space<vmem>>, %arg9: memref<1x1xf32, #tpu.memory_space<vmem>>) attributes {dimension_semantics = [], scalar_prefetch = 0 : i64, scratch_operands = 0 : i64, tpu.core_type = #tpu.core_type<tc>} {
    %c0 = arith.constant 0 : index
    %c0_0 = arith.constant 0 : index
    %0 = vector.load %arg1[%c0, %c0_0] : memref<8x80xf32, #tpu.memory_space<vmem>>, vector<8x80xf32>
    %c0_1 = arith.constant 0 : index
    %c0_2 = arith.constant 0 : index
    %1 = vector.load %arg4[%c0_1, %c0_2] : memref<20x80xf32, #tpu.memory_space<vmem>>, vector<20x80xf32>
    %c0_3 = arith.constant 0 : index
    %c0_4 = arith.constant 0 : index
    %2 = vector.load %arg2[%c0_3, %c0_4] : memref<20x80xf32, #tpu.memory_space<vmem>>, vector<20x80xf32>
    %c0_5 = arith.constant 0 : index
    %c0_6 = arith.constant 0 : index
    %3 = vector.load %arg5[%c0_5, %c0_6] : memref<20x80xf32, #tpu.memory_space<vmem>>, vector<20x80xf32>
    %c0_7 = arith.constant 0 : index
    %c0_8 = arith.constant 0 : index
    %4 = vector.load %arg3[%c0_7, %c0_8] : memref<1x80xf32, #tpu.memory_space<vmem>>, vector<1x80xf32>
    %c0_9 = arith.constant 0 : index
    %c0_10 = arith.constant 0 : index
    %5 = vector.load %arg6[%c0_9, %c0_10] : memref<1x80xf32, #tpu.memory_space<vmem>>, vector<1x80xf32>
    %c0_11 = arith.constant 0 : index
    %c0_12 = arith.constant 0 : index
    %6 = vector.load %arg0[%c0_11, %c0_12] : memref<8x8xf32, #tpu.memory_space<vmem>>, vector<8x8xf32>
    %cst = arith.constant dense<0.000000e+00> : vector<8x80xf32>
    %7 = tpu.matmul %6, %0, %cst {dimension_numbers = #tpu.dot_dimension_numbers<[1], [0], [0], [1], [0, 0, 1, 1], [], []>} : vector<8x8xf32>, vector<8x80xf32>, vector<8x80xf32> -> vector<8x80xf32>
    %8 = vector.broadcast %4 : vector<1x80xf32> to vector<8x80xf32>
    %9 = arith.addf %7, %8 : vector<8x80xf32>
    %10 = vector.extract_strided_slice %9 {offsets = [0, 0], sizes = [1, 80], strides = [1, 1]} : vector<8x80xf32> to vector<1x80xf32>
    %11 = vector.extract_strided_slice %9 {offsets = [1, 0], sizes = [1, 80], strides = [1, 1]} : vector<8x80xf32> to vector<1x80xf32>
    %12 = vector.extract_strided_slice %9 {offsets = [2, 0], sizes = [1, 80], strides = [1, 1]} : vector<8x80xf32> to vector<1x80xf32>
    %13 = vector.extract_strided_slice %9 {offsets = [3, 0], sizes = [1, 80], strides = [1, 1]} : vector<8x80xf32> to vector<1x80xf32>
    %14 = vector.extract_strided_slice %9 {offsets = [4, 0], sizes = [1, 80], strides = [1, 1]} : vector<8x80xf32> to vector<1x80xf32>
    %15 = vector.extract_strided_slice %9 {offsets = [5, 0], sizes = [1, 80], strides = [1, 1]} : vector<8x80xf32> to vector<1x80xf32>
    %16 = vector.extract_strided_slice %9 {offsets = [6, 0], sizes = [1, 80], strides = [1, 1]} : vector<8x80xf32> to vector<1x80xf32>
    %17 = vector.extract_strided_slice %9 {offsets = [7, 0], sizes = [1, 80], strides = [1, 1]} : vector<8x80xf32> to vector<1x80xf32>
    %cst_13 = arith.constant 0.000000e+00 : f32
    %18 = vector.broadcast %cst_13 : f32 to vector<1x20xf32>
    %cst_14 = arith.constant 0.000000e+00 : f32
    %19 = vector.broadcast %cst_14 : f32 to vector<1x20xf32>
    %cst_15 = arith.constant 0.000000e+00 : f32
    %20 = vector.broadcast %cst_15 : f32 to vector<1x20xf32>
    %cst_16 = arith.constant 0.000000e+00 : f32
    %21 = vector.broadcast %cst_16 : f32 to vector<1x20xf32>
    %cst_17 = arith.constant dense<0.000000e+00> : vector<1x80xf32>
    %22 = tpu.matmul %18, %2, %cst_17 {dimension_numbers = #tpu.dot_dimension_numbers<[1], [0], [0], [1], [0, 0, 1, 1], [], []>} : vector<1x20xf32>, vector<20x80xf32>, vector<1x80xf32> -> vector<1x80xf32>
    %23 = arith.addf %10, %22 : vector<1x80xf32>
    %24 = math.tanh %23 : vector<1x80xf32>
    %25 = vector.extract_strided_slice %24 {offsets = [0, 0], sizes = [1, 60], strides = [1, 1]} : vector<1x80xf32> to vector<1x60xf32>
    %cst_18 = arith.constant 1.000000e+00 : f32
    %26 = vector.broadcast %cst_18 : f32 to vector<1x60xf32>
    %27 = arith.addf %25, %26 : vector<1x60xf32>
    %cst_19 = arith.constant 5.000000e-01 : f32
    %28 = vector.broadcast %cst_19 : f32 to vector<1x60xf32>
    %29 = arith.mulf %28, %27 : vector<1x60xf32>
    %30 = vector.extract_strided_slice %29 {offsets = [0, 0], sizes = [1, 20], strides = [1, 1]} : vector<1x60xf32> to vector<1x20xf32>
    %31 = vector.extract_strided_slice %29 {offsets = [0, 20], sizes = [1, 20], strides = [1, 1]} : vector<1x60xf32> to vector<1x20xf32>
    %32 = vector.extract_strided_slice %29 {offsets = [0, 40], sizes = [1, 20], strides = [1, 1]} : vector<1x60xf32> to vector<1x20xf32>
    %33 = vector.extract_strided_slice %24 {offsets = [0, 60], sizes = [1, 20], strides = [1, 1]} : vector<1x80xf32> to vector<1x20xf32>
    %34 = arith.mulf %31, %20 : vector<1x20xf32>
    %35 = arith.mulf %30, %33 : vector<1x20xf32>
    %36 = arith.addf %34, %35 : vector<1x20xf32>
    %37 = math.tanh %36 : vector<1x20xf32>
    %38 = arith.mulf %32, %37 : vector<1x20xf32>
    %cst_20 = arith.constant dense<0.000000e+00> : vector<1x80xf32>
    %39 = tpu.matmul %38, %1, %cst_20 {dimension_numbers = #tpu.dot_dimension_numbers<[1], [0], [0], [1], [0, 0, 1, 1], [], []>} : vector<1x20xf32>, vector<20x80xf32>, vector<1x80xf32> -> vector<1x80xf32>
    %40 = arith.addf %39, %5 : vector<1x80xf32>
    %cst_21 = arith.constant dense<0.000000e+00> : vector<1x80xf32>
    %41 = tpu.matmul %19, %3, %cst_21 {dimension_numbers = #tpu.dot_dimension_numbers<[1], [0], [0], [1], [0, 0, 1, 1], [], []>} : vector<1x20xf32>, vector<20x80xf32>, vector<1x80xf32> -> vector<1x80xf32>
    %42 = arith.addf %40, %41 : vector<1x80xf32>
    %43 = math.tanh %42 : vector<1x80xf32>
    %44 = vector.extract_strided_slice %43 {offsets = [0, 0], sizes = [1, 60], strides = [1, 1]} : vector<1x80xf32> to vector<1x60xf32>
    %cst_22 = arith.constant 1.000000e+00 : f32
    %45 = vector.broadcast %cst_22 : f32 to vector<1x60xf32>
    %46 = arith.addf %44, %45 : vector<1x60xf32>
    %cst_23 = arith.constant 5.000000e-01 : f32
    %47 = vector.broadcast %cst_23 : f32 to vector<1x60xf32>
    %48 = arith.mulf %47, %46 : vector<1x60xf32>
    %49 = vector.extract_strided_slice %48 {offsets = [0, 0], sizes = [1, 20], strides = [1, 1]} : vector<1x60xf32> to vector<1x20xf32>
    %50 = vector.extract_strided_slice %48 {offsets = [0, 20], sizes = [1, 20], strides = [1, 1]} : vector<1x60xf32> to vector<1x20xf32>
    %51 = vector.extract_strided_slice %48 {offsets = [0, 40], sizes = [1, 20], strides = [1, 1]} : vector<1x60xf32> to vector<1x20xf32>
    %52 = vector.extract_strided_slice %43 {offsets = [0, 60], sizes = [1, 20], strides = [1, 1]} : vector<1x80xf32> to vector<1x20xf32>
    %53 = arith.mulf %50, %21 : vector<1x20xf32>
    %54 = arith.mulf %49, %52 : vector<1x20xf32>
    %55 = arith.addf %53, %54 : vector<1x20xf32>
    %56 = math.tanh %55 : vector<1x20xf32>
    %57 = arith.mulf %51, %56 : vector<1x20xf32>
    %cst_24 = arith.constant dense<0.000000e+00> : vector<1x80xf32>
    %58 = tpu.matmul %38, %2, %cst_24 {dimension_numbers = #tpu.dot_dimension_numbers<[1], [0], [0], [1], [0, 0, 1, 1], [], []>} : vector<1x20xf32>, vector<20x80xf32>, vector<1x80xf32> -> vector<1x80xf32>
    %59 = arith.addf %11, %58 : vector<1x80xf32>
    %60 = math.tanh %59 : vector<1x80xf32>
    %61 = vector.extract_strided_slice %60 {offsets = [0, 0], sizes = [1, 60], strides = [1, 1]} : vector<1x80xf32> to vector<1x60xf32>
    %cst_25 = arith.constant 1.000000e+00 : f32
    %62 = vector.broadcast %cst_25 : f32 to vector<1x60xf32>
    %63 = arith.addf %61, %62 : vector<1x60xf32>
    %cst_26 = arith.constant 5.000000e-01 : f32
    %64 = vector.broadcast %cst_26 : f32 to vector<1x60xf32>
    %65 = arith.mulf %64, %63 : vector<1x60xf32>
    %66 = vector.extract_strided_slice %65 {offsets = [0, 0], sizes = [1, 20], strides = [1, 1]} : vector<1x60xf32> to vector<1x20xf32>
    %67 = vector.extract_strided_slice %65 {offsets = [0, 20], sizes = [1, 20], strides = [1, 1]} : vector<1x60xf32> to vector<1x20xf32>
    %68 = vector.extract_strided_slice %65 {offsets = [0, 40], sizes = [1, 20], strides = [1, 1]} : vector<1x60xf32> to vector<1x20xf32>
    %69 = vector.extract_strided_slice %60 {offsets = [0, 60], sizes = [1, 20], strides = [1, 1]} : vector<1x80xf32> to vector<1x20xf32>
    %70 = arith.mulf %67, %36 : vector<1x20xf32>
    %71 = arith.mulf %66, %69 : vector<1x20xf32>
    %72 = arith.addf %70, %71 : vector<1x20xf32>
    %73 = math.tanh %72 : vector<1x20xf32>
    %74 = arith.mulf %68, %73 : vector<1x20xf32>
    %cst_27 = arith.constant dense<0.000000e+00> : vector<1x80xf32>
    %75 = tpu.matmul %74, %1, %cst_27 {dimension_numbers = #tpu.dot_dimension_numbers<[1], [0], [0], [1], [0, 0, 1, 1], [], []>} : vector<1x20xf32>, vector<20x80xf32>, vector<1x80xf32> -> vector<1x80xf32>
    %76 = arith.addf %75, %5 : vector<1x80xf32>
    %cst_28 = arith.constant dense<0.000000e+00> : vector<1x80xf32>
    %77 = tpu.matmul %57, %3, %cst_28 {dimension_numbers = #tpu.dot_dimension_numbers<[1], [0], [0], [1], [0, 0, 1, 1], [], []>} : vector<1x20xf32>, vector<20x80xf32>, vector<1x80xf32> -> vector<1x80xf32>
    %78 = arith.addf %76, %77 : vector<1x80xf32>
    %79 = math.tanh %78 : vector<1x80xf32>
    %80 = vector.extract_strided_slice %79 {offsets = [0, 0], sizes = [1, 60], strides = [1, 1]} : vector<1x80xf32> to vector<1x60xf32>
    %cst_29 = arith.constant 1.000000e+00 : f32
    %81 = vector.broadcast %cst_29 : f32 to vector<1x60xf32>
    %82 = arith.addf %80, %81 : vector<1x60xf32>
    %cst_30 = arith.constant 5.000000e-01 : f32
    %83 = vector.broadcast %cst_30 : f32 to vector<1x60xf32>
    %84 = arith.mulf %83, %82 : vector<1x60xf32>
    %85 = vector.extract_strided_slice %84 {offsets = [0, 0], sizes = [1, 20], strides = [1, 1]} : vector<1x60xf32> to vector<1x20xf32>
    %86 = vector.extract_strided_slice %84 {offsets = [0, 20], sizes = [1, 20], strides = [1, 1]} : vector<1x60xf32> to vector<1x20xf32>
    %87 = vector.extract_strided_slice %84 {offsets = [0, 40], sizes = [1, 20], strides = [1, 1]} : vector<1x60xf32> to vector<1x20xf32>
    %88 = vector.extract_strided_slice %79 {offsets = [0, 60], sizes = [1, 20], strides = [1, 1]} : vector<1x80xf32> to vector<1x20xf32>
    %89 = arith.mulf %86, %55 : vector<1x20xf32>
    %90 = arith.mulf %85, %88 : vector<1x20xf32>
    %91 = arith.addf %89, %90 : vector<1x20xf32>
    %92 = math.tanh %91 : vector<1x20xf32>
    %93 = arith.mulf %87, %92 : vector<1x20xf32>
    %cst_31 = arith.constant dense<0.000000e+00> : vector<1x80xf32>
    %94 = tpu.matmul %74, %2, %cst_31 {dimension_numbers = #tpu.dot_dimension_numbers<[1], [0], [0], [1], [0, 0, 1, 1], [], []>} : vector<1x20xf32>, vector<20x80xf32>, vector<1x80xf32> -> vector<1x80xf32>
    %95 = arith.addf %12, %94 : vector<1x80xf32>
    %96 = math.tanh %95 : vector<1x80xf32>
    %97 = vector.extract_strided_slice %96 {offsets = [0, 0], sizes = [1, 60], strides = [1, 1]} : vector<1x80xf32> to vector<1x60xf32>
    %cst_32 = arith.constant 1.000000e+00 : f32
    %98 = vector.broadcast %cst_32 : f32 to vector<1x60xf32>
    %99 = arith.addf %97, %98 : vector<1x60xf32>
    %cst_33 = arith.constant 5.000000e-01 : f32
    %100 = vector.broadcast %cst_33 : f32 to vector<1x60xf32>
    %101 = arith.mulf %100, %99 : vector<1x60xf32>
    %102 = vector.extract_strided_slice %101 {offsets = [0, 0], sizes = [1, 20], strides = [1, 1]} : vector<1x60xf32> to vector<1x20xf32>
    %103 = vector.extract_strided_slice %101 {offsets = [0, 20], sizes = [1, 20], strides = [1, 1]} : vector<1x60xf32> to vector<1x20xf32>
    %104 = vector.extract_strided_slice %101 {offsets = [0, 40], sizes = [1, 20], strides = [1, 1]} : vector<1x60xf32> to vector<1x20xf32>
    %105 = vector.extract_strided_slice %96 {offsets = [0, 60], sizes = [1, 20], strides = [1, 1]} : vector<1x80xf32> to vector<1x20xf32>
    %106 = arith.mulf %103, %72 : vector<1x20xf32>
    %107 = arith.mulf %102, %105 : vector<1x20xf32>
    %108 = arith.addf %106, %107 : vector<1x20xf32>
    %109 = math.tanh %108 : vector<1x20xf32>
    %110 = arith.mulf %104, %109 : vector<1x20xf32>
    %cst_34 = arith.constant dense<0.000000e+00> : vector<1x80xf32>
    %111 = tpu.matmul %110, %1, %cst_34 {dimension_numbers = #tpu.dot_dimension_numbers<[1], [0], [0], [1], [0, 0, 1, 1], [], []>} : vector<1x20xf32>, vector<20x80xf32>, vector<1x80xf32> -> vector<1x80xf32>
    %112 = arith.addf %111, %5 : vector<1x80xf32>
    %cst_35 = arith.constant dense<0.000000e+00> : vector<1x80xf32>
    %113 = tpu.matmul %93, %3, %cst_35 {dimension_numbers = #tpu.dot_dimension_numbers<[1], [0], [0], [1], [0, 0, 1, 1], [], []>} : vector<1x20xf32>, vector<20x80xf32>, vector<1x80xf32> -> vector<1x80xf32>
    %114 = arith.addf %112, %113 : vector<1x80xf32>
    %115 = math.tanh %114 : vector<1x80xf32>
    %116 = vector.extract_strided_slice %115 {offsets = [0, 0], sizes = [1, 60], strides = [1, 1]} : vector<1x80xf32> to vector<1x60xf32>
    %cst_36 = arith.constant 1.000000e+00 : f32
    %117 = vector.broadcast %cst_36 : f32 to vector<1x60xf32>
    %118 = arith.addf %116, %117 : vector<1x60xf32>
    %cst_37 = arith.constant 5.000000e-01 : f32
    %119 = vector.broadcast %cst_37 : f32 to vector<1x60xf32>
    %120 = arith.mulf %119, %118 : vector<1x60xf32>
    %121 = vector.extract_strided_slice %120 {offsets = [0, 0], sizes = [1, 20], strides = [1, 1]} : vector<1x60xf32> to vector<1x20xf32>
    %122 = vector.extract_strided_slice %120 {offsets = [0, 20], sizes = [1, 20], strides = [1, 1]} : vector<1x60xf32> to vector<1x20xf32>
    %123 = vector.extract_strided_slice %120 {offsets = [0, 40], sizes = [1, 20], strides = [1, 1]} : vector<1x60xf32> to vector<1x20xf32>
    %124 = vector.extract_strided_slice %115 {offsets = [0, 60], sizes = [1, 20], strides = [1, 1]} : vector<1x80xf32> to vector<1x20xf32>
    %125 = arith.mulf %122, %91 : vector<1x20xf32>
    %126 = arith.mulf %121, %124 : vector<1x20xf32>
    %127 = arith.addf %125, %126 : vector<1x20xf32>
    %128 = math.tanh %127 : vector<1x20xf32>
    %129 = arith.mulf %123, %128 : vector<1x20xf32>
    %cst_38 = arith.constant dense<0.000000e+00> : vector<1x80xf32>
    %130 = tpu.matmul %110, %2, %cst_38 {dimension_numbers = #tpu.dot_dimension_numbers<[1], [0], [0], [1], [0, 0, 1, 1], [], []>} : vector<1x20xf32>, vector<20x80xf32>, vector<1x80xf32> -> vector<1x80xf32>
    %131 = arith.addf %13, %130 : vector<1x80xf32>
    %132 = math.tanh %131 : vector<1x80xf32>
    %133 = vector.extract_strided_slice %132 {offsets = [0, 0], sizes = [1, 60], strides = [1, 1]} : vector<1x80xf32> to vector<1x60xf32>
    %cst_39 = arith.constant 1.000000e+00 : f32
    %134 = vector.broadcast %cst_39 : f32 to vector<1x60xf32>
    %135 = arith.addf %133, %134 : vector<1x60xf32>
    %cst_40 = arith.constant 5.000000e-01 : f32
    %136 = vector.broadcast %cst_40 : f32 to vector<1x60xf32>
    %137 = arith.mulf %136, %135 : vector<1x60xf32>
    %138 = vector.extract_strided_slice %137 {offsets = [0, 0], sizes = [1, 20], strides = [1, 1]} : vector<1x60xf32> to vector<1x20xf32>
    %139 = vector.extract_strided_slice %137 {offsets = [0, 20], sizes = [1, 20], strides = [1, 1]} : vector<1x60xf32> to vector<1x20xf32>
    %140 = vector.extract_strided_slice %137 {offsets = [0, 40], sizes = [1, 20], strides = [1, 1]} : vector<1x60xf32> to vector<1x20xf32>
    %141 = vector.extract_strided_slice %132 {offsets = [0, 60], sizes = [1, 20], strides = [1, 1]} : vector<1x80xf32> to vector<1x20xf32>
    %142 = arith.mulf %139, %108 : vector<1x20xf32>
    %143 = arith.mulf %138, %141 : vector<1x20xf32>
    %144 = arith.addf %142, %143 : vector<1x20xf32>
    %145 = math.tanh %144 : vector<1x20xf32>
    %146 = arith.mulf %140, %145 : vector<1x20xf32>
    %cst_41 = arith.constant dense<0.000000e+00> : vector<1x80xf32>
    %147 = tpu.matmul %146, %1, %cst_41 {dimension_numbers = #tpu.dot_dimension_numbers<[1], [0], [0], [1], [0, 0, 1, 1], [], []>} : vector<1x20xf32>, vector<20x80xf32>, vector<1x80xf32> -> vector<1x80xf32>
    %148 = arith.addf %147, %5 : vector<1x80xf32>
    %cst_42 = arith.constant dense<0.000000e+00> : vector<1x80xf32>
    %149 = tpu.matmul %129, %3, %cst_42 {dimension_numbers = #tpu.dot_dimension_numbers<[1], [0], [0], [1], [0, 0, 1, 1], [], []>} : vector<1x20xf32>, vector<20x80xf32>, vector<1x80xf32> -> vector<1x80xf32>
    %150 = arith.addf %148, %149 : vector<1x80xf32>
    %151 = math.tanh %150 : vector<1x80xf32>
    %152 = vector.extract_strided_slice %151 {offsets = [0, 0], sizes = [1, 60], strides = [1, 1]} : vector<1x80xf32> to vector<1x60xf32>
    %cst_43 = arith.constant 1.000000e+00 : f32
    %153 = vector.broadcast %cst_43 : f32 to vector<1x60xf32>
    %154 = arith.addf %152, %153 : vector<1x60xf32>
    %cst_44 = arith.constant 5.000000e-01 : f32
    %155 = vector.broadcast %cst_44 : f32 to vector<1x60xf32>
    %156 = arith.mulf %155, %154 : vector<1x60xf32>
    %157 = vector.extract_strided_slice %156 {offsets = [0, 0], sizes = [1, 20], strides = [1, 1]} : vector<1x60xf32> to vector<1x20xf32>
    %158 = vector.extract_strided_slice %156 {offsets = [0, 20], sizes = [1, 20], strides = [1, 1]} : vector<1x60xf32> to vector<1x20xf32>
    %159 = vector.extract_strided_slice %156 {offsets = [0, 40], sizes = [1, 20], strides = [1, 1]} : vector<1x60xf32> to vector<1x20xf32>
    %160 = vector.extract_strided_slice %151 {offsets = [0, 60], sizes = [1, 20], strides = [1, 1]} : vector<1x80xf32> to vector<1x20xf32>
    %161 = arith.mulf %158, %127 : vector<1x20xf32>
    %162 = arith.mulf %157, %160 : vector<1x20xf32>
    %163 = arith.addf %161, %162 : vector<1x20xf32>
    %164 = math.tanh %163 : vector<1x20xf32>
    %165 = arith.mulf %159, %164 : vector<1x20xf32>
    %cst_45 = arith.constant dense<0.000000e+00> : vector<1x80xf32>
    %166 = tpu.matmul %146, %2, %cst_45 {dimension_numbers = #tpu.dot_dimension_numbers<[1], [0], [0], [1], [0, 0, 1, 1], [], []>} : vector<1x20xf32>, vector<20x80xf32>, vector<1x80xf32> -> vector<1x80xf32>
    %167 = arith.addf %14, %166 : vector<1x80xf32>
    %168 = math.tanh %167 : vector<1x80xf32>
    %169 = vector.extract_strided_slice %168 {offsets = [0, 0], sizes = [1, 60], strides = [1, 1]} : vector<1x80xf32> to vector<1x60xf32>
    %cst_46 = arith.constant 1.000000e+00 : f32
    %170 = vector.broadcast %cst_46 : f32 to vector<1x60xf32>
    %171 = arith.addf %169, %170 : vector<1x60xf32>
    %cst_47 = arith.constant 5.000000e-01 : f32
    %172 = vector.broadcast %cst_47 : f32 to vector<1x60xf32>
    %173 = arith.mulf %172, %171 : vector<1x60xf32>
    %174 = vector.extract_strided_slice %173 {offsets = [0, 0], sizes = [1, 20], strides = [1, 1]} : vector<1x60xf32> to vector<1x20xf32>
    %175 = vector.extract_strided_slice %173 {offsets = [0, 20], sizes = [1, 20], strides = [1, 1]} : vector<1x60xf32> to vector<1x20xf32>
    %176 = vector.extract_strided_slice %173 {offsets = [0, 40], sizes = [1, 20], strides = [1, 1]} : vector<1x60xf32> to vector<1x20xf32>
    %177 = vector.extract_strided_slice %168 {offsets = [0, 60], sizes = [1, 20], strides = [1, 1]} : vector<1x80xf32> to vector<1x20xf32>
    %178 = arith.mulf %175, %144 : vector<1x20xf32>
    %179 = arith.mulf %174, %177 : vector<1x20xf32>
    %180 = arith.addf %178, %179 : vector<1x20xf32>
    %181 = math.tanh %180 : vector<1x20xf32>
    %182 = arith.mulf %176, %181 : vector<1x20xf32>
    %cst_48 = arith.constant dense<0.000000e+00> : vector<1x80xf32>
    %183 = tpu.matmul %182, %1, %cst_48 {dimension_numbers = #tpu.dot_dimension_numbers<[1], [0], [0], [1], [0, 0, 1, 1], [], []>} : vector<1x20xf32>, vector<20x80xf32>, vector<1x80xf32> -> vector<1x80xf32>
    %184 = arith.addf %183, %5 : vector<1x80xf32>
    %cst_49 = arith.constant dense<0.000000e+00> : vector<1x80xf32>
    %185 = tpu.matmul %165, %3, %cst_49 {dimension_numbers = #tpu.dot_dimension_numbers<[1], [0], [0], [1], [0, 0, 1, 1], [], []>} : vector<1x20xf32>, vector<20x80xf32>, vector<1x80xf32> -> vector<1x80xf32>
    %186 = arith.addf %184, %185 : vector<1x80xf32>
    %187 = math.tanh %186 : vector<1x80xf32>
    %188 = vector.extract_strided_slice %187 {offsets = [0, 0], sizes = [1, 60], strides = [1, 1]} : vector<1x80xf32> to vector<1x60xf32>
    %cst_50 = arith.constant 1.000000e+00 : f32
    %189 = vector.broadcast %cst_50 : f32 to vector<1x60xf32>
    %190 = arith.addf %188, %189 : vector<1x60xf32>
    %cst_51 = arith.constant 5.000000e-01 : f32
    %191 = vector.broadcast %cst_51 : f32 to vector<1x60xf32>
    %192 = arith.mulf %191, %190 : vector<1x60xf32>
    %193 = vector.extract_strided_slice %192 {offsets = [0, 0], sizes = [1, 20], strides = [1, 1]} : vector<1x60xf32> to vector<1x20xf32>
    %194 = vector.extract_strided_slice %192 {offsets = [0, 20], sizes = [1, 20], strides = [1, 1]} : vector<1x60xf32> to vector<1x20xf32>
    %195 = vector.extract_strided_slice %192 {offsets = [0, 40], sizes = [1, 20], strides = [1, 1]} : vector<1x60xf32> to vector<1x20xf32>
    %196 = vector.extract_strided_slice %187 {offsets = [0, 60], sizes = [1, 20], strides = [1, 1]} : vector<1x80xf32> to vector<1x20xf32>
    %197 = arith.mulf %194, %163 : vector<1x20xf32>
    %198 = arith.mulf %193, %196 : vector<1x20xf32>
    %199 = arith.addf %197, %198 : vector<1x20xf32>
    %200 = math.tanh %199 : vector<1x20xf32>
    %201 = arith.mulf %195, %200 : vector<1x20xf32>
    %cst_52 = arith.constant dense<0.000000e+00> : vector<1x80xf32>
    %202 = tpu.matmul %182, %2, %cst_52 {dimension_numbers = #tpu.dot_dimension_numbers<[1], [0], [0], [1], [0, 0, 1, 1], [], []>} : vector<1x20xf32>, vector<20x80xf32>, vector<1x80xf32> -> vector<1x80xf32>
    %203 = arith.addf %15, %202 : vector<1x80xf32>
    %204 = math.tanh %203 : vector<1x80xf32>
    %205 = vector.extract_strided_slice %204 {offsets = [0, 0], sizes = [1, 60], strides = [1, 1]} : vector<1x80xf32> to vector<1x60xf32>
    %cst_53 = arith.constant 1.000000e+00 : f32
    %206 = vector.broadcast %cst_53 : f32 to vector<1x60xf32>
    %207 = arith.addf %205, %206 : vector<1x60xf32>
    %cst_54 = arith.constant 5.000000e-01 : f32
    %208 = vector.broadcast %cst_54 : f32 to vector<1x60xf32>
    %209 = arith.mulf %208, %207 : vector<1x60xf32>
    %210 = vector.extract_strided_slice %209 {offsets = [0, 0], sizes = [1, 20], strides = [1, 1]} : vector<1x60xf32> to vector<1x20xf32>
    %211 = vector.extract_strided_slice %209 {offsets = [0, 20], sizes = [1, 20], strides = [1, 1]} : vector<1x60xf32> to vector<1x20xf32>
    %212 = vector.extract_strided_slice %209 {offsets = [0, 40], sizes = [1, 20], strides = [1, 1]} : vector<1x60xf32> to vector<1x20xf32>
    %213 = vector.extract_strided_slice %204 {offsets = [0, 60], sizes = [1, 20], strides = [1, 1]} : vector<1x80xf32> to vector<1x20xf32>
    %214 = arith.mulf %211, %180 : vector<1x20xf32>
    %215 = arith.mulf %210, %213 : vector<1x20xf32>
    %216 = arith.addf %214, %215 : vector<1x20xf32>
    %217 = math.tanh %216 : vector<1x20xf32>
    %218 = arith.mulf %212, %217 : vector<1x20xf32>
    %cst_55 = arith.constant dense<0.000000e+00> : vector<1x80xf32>
    %219 = tpu.matmul %218, %1, %cst_55 {dimension_numbers = #tpu.dot_dimension_numbers<[1], [0], [0], [1], [0, 0, 1, 1], [], []>} : vector<1x20xf32>, vector<20x80xf32>, vector<1x80xf32> -> vector<1x80xf32>
    %220 = arith.addf %219, %5 : vector<1x80xf32>
    %cst_56 = arith.constant dense<0.000000e+00> : vector<1x80xf32>
    %221 = tpu.matmul %201, %3, %cst_56 {dimension_numbers = #tpu.dot_dimension_numbers<[1], [0], [0], [1], [0, 0, 1, 1], [], []>} : vector<1x20xf32>, vector<20x80xf32>, vector<1x80xf32> -> vector<1x80xf32>
    %222 = arith.addf %220, %221 : vector<1x80xf32>
    %223 = math.tanh %222 : vector<1x80xf32>
    %224 = vector.extract_strided_slice %223 {offsets = [0, 0], sizes = [1, 60], strides = [1, 1]} : vector<1x80xf32> to vector<1x60xf32>
    %cst_57 = arith.constant 1.000000e+00 : f32
    %225 = vector.broadcast %cst_57 : f32 to vector<1x60xf32>
    %226 = arith.addf %224, %225 : vector<1x60xf32>
    %cst_58 = arith.constant 5.000000e-01 : f32
    %227 = vector.broadcast %cst_58 : f32 to vector<1x60xf32>
    %228 = arith.mulf %227, %226 : vector<1x60xf32>
    %229 = vector.extract_strided_slice %228 {offsets = [0, 0], sizes = [1, 20], strides = [1, 1]} : vector<1x60xf32> to vector<1x20xf32>
    %230 = vector.extract_strided_slice %228 {offsets = [0, 20], sizes = [1, 20], strides = [1, 1]} : vector<1x60xf32> to vector<1x20xf32>
    %231 = vector.extract_strided_slice %228 {offsets = [0, 40], sizes = [1, 20], strides = [1, 1]} : vector<1x60xf32> to vector<1x20xf32>
    %232 = vector.extract_strided_slice %223 {offsets = [0, 60], sizes = [1, 20], strides = [1, 1]} : vector<1x80xf32> to vector<1x20xf32>
    %233 = arith.mulf %230, %199 : vector<1x20xf32>
    %234 = arith.mulf %229, %232 : vector<1x20xf32>
    %235 = arith.addf %233, %234 : vector<1x20xf32>
    %236 = math.tanh %235 : vector<1x20xf32>
    %237 = arith.mulf %231, %236 : vector<1x20xf32>
    %cst_59 = arith.constant dense<0.000000e+00> : vector<1x80xf32>
    %238 = tpu.matmul %218, %2, %cst_59 {dimension_numbers = #tpu.dot_dimension_numbers<[1], [0], [0], [1], [0, 0, 1, 1], [], []>} : vector<1x20xf32>, vector<20x80xf32>, vector<1x80xf32> -> vector<1x80xf32>
    %239 = arith.addf %16, %238 : vector<1x80xf32>
    %240 = math.tanh %239 : vector<1x80xf32>
    %241 = vector.extract_strided_slice %240 {offsets = [0, 0], sizes = [1, 60], strides = [1, 1]} : vector<1x80xf32> to vector<1x60xf32>
    %cst_60 = arith.constant 1.000000e+00 : f32
    %242 = vector.broadcast %cst_60 : f32 to vector<1x60xf32>
    %243 = arith.addf %241, %242 : vector<1x60xf32>
    %cst_61 = arith.constant 5.000000e-01 : f32
    %244 = vector.broadcast %cst_61 : f32 to vector<1x60xf32>
    %245 = arith.mulf %244, %243 : vector<1x60xf32>
    %246 = vector.extract_strided_slice %245 {offsets = [0, 0], sizes = [1, 20], strides = [1, 1]} : vector<1x60xf32> to vector<1x20xf32>
    %247 = vector.extract_strided_slice %245 {offsets = [0, 20], sizes = [1, 20], strides = [1, 1]} : vector<1x60xf32> to vector<1x20xf32>
    %248 = vector.extract_strided_slice %245 {offsets = [0, 40], sizes = [1, 20], strides = [1, 1]} : vector<1x60xf32> to vector<1x20xf32>
    %249 = vector.extract_strided_slice %240 {offsets = [0, 60], sizes = [1, 20], strides = [1, 1]} : vector<1x80xf32> to vector<1x20xf32>
    %250 = arith.mulf %247, %216 : vector<1x20xf32>
    %251 = arith.mulf %246, %249 : vector<1x20xf32>
    %252 = arith.addf %250, %251 : vector<1x20xf32>
    %253 = math.tanh %252 : vector<1x20xf32>
    %254 = arith.mulf %248, %253 : vector<1x20xf32>
    %cst_62 = arith.constant dense<0.000000e+00> : vector<1x80xf32>
    %255 = tpu.matmul %254, %1, %cst_62 {dimension_numbers = #tpu.dot_dimension_numbers<[1], [0], [0], [1], [0, 0, 1, 1], [], []>} : vector<1x20xf32>, vector<20x80xf32>, vector<1x80xf32> -> vector<1x80xf32>
    %256 = arith.addf %255, %5 : vector<1x80xf32>
    %cst_63 = arith.constant dense<0.000000e+00> : vector<1x80xf32>
    %257 = tpu.matmul %237, %3, %cst_63 {dimension_numbers = #tpu.dot_dimension_numbers<[1], [0], [0], [1], [0, 0, 1, 1], [], []>} : vector<1x20xf32>, vector<20x80xf32>, vector<1x80xf32> -> vector<1x80xf32>
    %258 = arith.addf %256, %257 : vector<1x80xf32>
    %259 = math.tanh %258 : vector<1x80xf32>
    %260 = vector.extract_strided_slice %259 {offsets = [0, 0], sizes = [1, 60], strides = [1, 1]} : vector<1x80xf32> to vector<1x60xf32>
    %cst_64 = arith.constant 1.000000e+00 : f32
    %261 = vector.broadcast %cst_64 : f32 to vector<1x60xf32>
    %262 = arith.addf %260, %261 : vector<1x60xf32>
    %cst_65 = arith.constant 5.000000e-01 : f32
    %263 = vector.broadcast %cst_65 : f32 to vector<1x60xf32>
    %264 = arith.mulf %263, %262 : vector<1x60xf32>
    %265 = vector.extract_strided_slice %264 {offsets = [0, 0], sizes = [1, 20], strides = [1, 1]} : vector<1x60xf32> to vector<1x20xf32>
    %266 = vector.extract_strided_slice %264 {offsets = [0, 20], sizes = [1, 20], strides = [1, 1]} : vector<1x60xf32> to vector<1x20xf32>
    %267 = vector.extract_strided_slice %264 {offsets = [0, 40], sizes = [1, 20], strides = [1, 1]} : vector<1x60xf32> to vector<1x20xf32>
    %268 = vector.extract_strided_slice %259 {offsets = [0, 60], sizes = [1, 20], strides = [1, 1]} : vector<1x80xf32> to vector<1x20xf32>
    %269 = arith.mulf %266, %235 : vector<1x20xf32>
    %270 = arith.mulf %265, %268 : vector<1x20xf32>
    %271 = arith.addf %269, %270 : vector<1x20xf32>
    %272 = math.tanh %271 : vector<1x20xf32>
    %273 = arith.mulf %267, %272 : vector<1x20xf32>
    %cst_66 = arith.constant dense<0.000000e+00> : vector<1x80xf32>
    %274 = tpu.matmul %254, %2, %cst_66 {dimension_numbers = #tpu.dot_dimension_numbers<[1], [0], [0], [1], [0, 0, 1, 1], [], []>} : vector<1x20xf32>, vector<20x80xf32>, vector<1x80xf32> -> vector<1x80xf32>
    %275 = arith.addf %17, %274 : vector<1x80xf32>
    %276 = math.tanh %275 : vector<1x80xf32>
    %277 = vector.extract_strided_slice %276 {offsets = [0, 0], sizes = [1, 60], strides = [1, 1]} : vector<1x80xf32> to vector<1x60xf32>
    %cst_67 = arith.constant 1.000000e+00 : f32
    %278 = vector.broadcast %cst_67 : f32 to vector<1x60xf32>
    %279 = arith.addf %277, %278 : vector<1x60xf32>
    %cst_68 = arith.constant 5.000000e-01 : f32
    %280 = vector.broadcast %cst_68 : f32 to vector<1x60xf32>
    %281 = arith.mulf %280, %279 : vector<1x60xf32>
    %282 = vector.extract_strided_slice %281 {offsets = [0, 0], sizes = [1, 20], strides = [1, 1]} : vector<1x60xf32> to vector<1x20xf32>
    %283 = vector.extract_strided_slice %281 {offsets = [0, 20], sizes = [1, 20], strides = [1, 1]} : vector<1x60xf32> to vector<1x20xf32>
    %284 = vector.extract_strided_slice %281 {offsets = [0, 40], sizes = [1, 20], strides = [1, 1]} : vector<1x60xf32> to vector<1x20xf32>
    %285 = vector.extract_strided_slice %276 {offsets = [0, 60], sizes = [1, 20], strides = [1, 1]} : vector<1x80xf32> to vector<1x20xf32>
    %286 = arith.mulf %283, %252 : vector<1x20xf32>
    %287 = arith.mulf %282, %285 : vector<1x20xf32>
    %288 = arith.addf %286, %287 : vector<1x20xf32>
    %289 = math.tanh %288 : vector<1x20xf32>
    %290 = arith.mulf %284, %289 : vector<1x20xf32>
    %cst_69 = arith.constant dense<0.000000e+00> : vector<1x80xf32>
    %291 = tpu.matmul %290, %1, %cst_69 {dimension_numbers = #tpu.dot_dimension_numbers<[1], [0], [0], [1], [0, 0, 1, 1], [], []>} : vector<1x20xf32>, vector<20x80xf32>, vector<1x80xf32> -> vector<1x80xf32>
    %292 = arith.addf %291, %5 : vector<1x80xf32>
    %cst_70 = arith.constant dense<0.000000e+00> : vector<1x80xf32>
    %293 = tpu.matmul %273, %3, %cst_70 {dimension_numbers = #tpu.dot_dimension_numbers<[1], [0], [0], [1], [0, 0, 1, 1], [], []>} : vector<1x20xf32>, vector<20x80xf32>, vector<1x80xf32> -> vector<1x80xf32>
    %294 = arith.addf %292, %293 : vector<1x80xf32>
    %295 = math.tanh %294 : vector<1x80xf32>
    %296 = vector.extract_strided_slice %295 {offsets = [0, 0], sizes = [1, 60], strides = [1, 1]} : vector<1x80xf32> to vector<1x60xf32>
    %cst_71 = arith.constant 1.000000e+00 : f32
    %297 = vector.broadcast %cst_71 : f32 to vector<1x60xf32>
    %298 = arith.addf %296, %297 : vector<1x60xf32>
    %cst_72 = arith.constant 5.000000e-01 : f32
    %299 = vector.broadcast %cst_72 : f32 to vector<1x60xf32>
    %300 = arith.mulf %299, %298 : vector<1x60xf32>
    %301 = vector.extract_strided_slice %300 {offsets = [0, 0], sizes = [1, 20], strides = [1, 1]} : vector<1x60xf32> to vector<1x20xf32>
    %302 = vector.extract_strided_slice %300 {offsets = [0, 20], sizes = [1, 20], strides = [1, 1]} : vector<1x60xf32> to vector<1x20xf32>
    %303 = vector.extract_strided_slice %300 {offsets = [0, 40], sizes = [1, 20], strides = [1, 1]} : vector<1x60xf32> to vector<1x20xf32>
    %304 = vector.extract_strided_slice %295 {offsets = [0, 60], sizes = [1, 20], strides = [1, 1]} : vector<1x80xf32> to vector<1x20xf32>
    %305 = arith.mulf %302, %271 : vector<1x20xf32>
    %306 = arith.mulf %301, %304 : vector<1x20xf32>
    %307 = arith.addf %305, %306 : vector<1x20xf32>
    %308 = math.tanh %307 : vector<1x20xf32>
    %309 = arith.mulf %303, %308 : vector<1x20xf32>
    %c0_73 = arith.constant 0 : index
    %c0_74 = arith.constant 0 : index
    %310 = vector.load %arg7[%c0_73, %c0_74] : memref<1x20xf32, #tpu.memory_space<vmem>>, vector<1x20xf32>
    %311 = arith.mulf %309, %310 : vector<1x20xf32>
    %cst_75 = arith.constant dense<0.000000e+00> : vector<1xf32>
    %312 = vector.multi_reduction <add>, %311, %cst_75 [1] : vector<1x20xf32> to vector<1xf32>
    %313 = vector.shape_cast %312 : vector<1xf32> to vector<1x1xf32>
    %c0_76 = arith.constant 0 : index
    %c0_77 = arith.constant 0 : index
    %314 = vector.load %arg8[%c0_76, %c0_77] : memref<1x1xf32, #tpu.memory_space<vmem>>, vector<1x1xf32>
    %315 = arith.addf %313, %314 : vector<1x1xf32>
    %316 = arith.negf %315 : vector<1x1xf32>
    %317 = math.exp %316 : vector<1x1xf32>
    %cst_78 = arith.constant 1.000000e+00 : f32
    %318 = vector.broadcast %cst_78 : f32 to vector<1x1xf32>
    %319 = arith.addf %318, %317 : vector<1x1xf32>
    %320 = arith.divf %318, %319 : vector<1x1xf32>
    %c0_79 = arith.constant 0 : index
    %c0_80 = arith.constant 0 : index
    %321 = vector.load %arg9[%c0_79, %c0_80] : memref<1x1xf32, #tpu.memory_space<vmem>>, vector<1x1xf32>
    tpu.vector_store %arg9[%c0_79, %c0_80], %320 {strides = array<i32>} : memref<1x1xf32, #tpu.memory_space<vmem>>, vector<1x1xf32>,
    return
  }
}

</mosaic_0001>

<bundles_post_ra>
// kernel: _rnn_forward.1
= control target key start
LH: loop header
LB: loop body
LE: loop exit
PB: predicated region body
PF: predicated region fallthrough
CT: control target
= control target key end

     0   :  { %s3299_s0 = inlined_call_operand.vmem [shape: f32[8,8], index: 0, kind: input, shape index: {}]   ;;  %s3300_s1 = inlined_call_operand.vmem [shape: f32[8,80], index: 1, kind: input, shape index: {}]   ;;  %s3301_s2 = inlined_call_operand.vmem [shape: f32[20,80], index: 2, kind: input, shape index: {}]   ;;  %s3302_s3 = inlined_call_operand.vmem [shape: f32[1,80], index: 3, kind: input, shape index: {}]   ;;  %s3303_s4 = inlined_call_operand.vmem [shape: f32[20,80], index: 4, kind: input, shape index: {}]   ;;  %s3304_s5 = inlined_call_operand.vmem [shape: f32[20,80], index: 5, kind: input, shape index: {}]   ;;  %s3305_s6 = inlined_call_operand.vmem [shape: f32[1,80], index: 6, kind: input, shape index: {}]   ;;  %s3306_s7 = inlined_call_operand.vmem [shape: f32[1,20], index: 7, kind: input, shape index: {}]   ;;  %s3307_s8 = inlined_call_operand.<no memory space> [shape: f32[1,1], index: 8, kind: input, shape index: {}]   ;;  %s3308_s9 = inlined_call_operand.hbm [shape: f32[1,1], index: 9, kind: output, shape index: {}]  }
   0x1   :  { %v14_v0 = vstv %s3307_s8 }
   0x2   :  { %15 = vst [vmem:[#allocation2] sm:$0x1] %v14_v0 }
   0x3   :  { %v35_v1 = vld [vmem:[%s3300_s1] sm:$0xff]  ;;  %vm54_vm0 = vcmask 64512   ;;  %v2889_v3 = vmov 0.0   ;;  %vm2890_vm1 = vmmov 0   ;;  %v40_v5 = vld [vmem:[%s3301_s2 + $0x8] sm:$0xff]  ;;  %v2891_v7 = vmov 0.0|0.0  }
   0x4   :  { %v47_v2 = vld [vmem:[%s3299_s0] sm:$0xff]  ;;  %2472 = vmatprep.subr.mxu0 %v2889_v3  ;;  %2474 = vmatprep.mubr.msk.f32.mxu0 %vm2890_vm1, %v2889_v3 }
   0x5   :  { %v39_v4 = vld [vmem:[%s3301_s2] sm:$0xff]  ;;  %2473 = vmatpush3.msra.mxu0 %v35_v1  ;;  %2702 = vmatprep.subr.bf16.mxu1 %v2891_v7 }
   0x6   :  { %v2965_v6 = vpack.c.bf16 %v40_v5, %v39_v4 }
   0x7   :  { %16 = vsyncpa [#allocation4], 0  ;;  %2475 = vmatmul.mubr.msk.f32.vlgmr.msra.gmra.mrb[0].mxu0 %vm54_vm0, %v47_v2  ;;  %2693 = vmatprep.subr.bf16.mxu0 %v2891_v7  ;;  %v2976_v8 = vld [vmem:[%s3301_s2 + $0x10] sm:$0xf]  ;;  %vm132_vm2 = vcmask 1043456   ;;  %s2892_s19 = smov 68  }
   0x8   :  { %2695 = vmatpush3.bf16.msra.mxu0 %v2965_v6  ;;  %2483 = vmatprep.mubr.msk.f32.mxu0 %vm2890_vm1, %v2889_v3  ;;  %v2324_v11 = vld [vmem:[%s3302_s3] ss:$0 sm:$0xff]  ;;  %s2893_s20 = smov 20   ;;  %v37_v25 = vld [vmem:[%s3303_s4 + $0x8] sm:$0xff]  ;;  %v3015_v27 = vld [vmem:[%s3303_s4 + $0x10] sm:$0xf] }
   0x9   :  { %2481 = vmatprep.subr.mxu0 %v2889_v3  ;;  %2704 = vmatpush3.bf16.msra.mxu1 %v2965_v6  ;;  %v36_v24 = vld [vmem:[%s3303_s4] sm:$0xff]  ;;  %s2894_s26 = smov 88   ;;  %v43_v32 = vld [vmem:[%s3304_s5 + $0x8] sm:$0xff]  ;;  %vm128_vm3 = vcmask 162816   ;;  %v3039_v35 = vld [vmem:[%s3304_s5 + $0x10] sm:$0xf] }
   0xa   :  { %2508 = vmatprep.subr.mxu1 %v2889_v3  ;;  %2510 = vmatprep.mubr.msk.f32.mxu1 %vm2890_vm1, %v2889_v3  ;;  %v3008_v26 = vpack.c.bf16 %v37_v25, %v36_v24  ;;  %v42_v31 = vld [vmem:[%s3304_s5] sm:$0xff]  ;;  %s2895_s13 = smov 40   ;;  %vm2296_vm4 = vcmask 155648   ;;  %vm2308_vm5 = vcmask 0  }
   0xb   :  { %v3028_v33 = vpack.c.bf16 %v43_v32, %v42_v31  ;;  %v3063_v40 = vld [vmem:[%s3305_s6] sm:$0x1] }
   0xc   :  { %2482 = vmatpush3.msk.msra.mxu0 %vm132_vm2, %v2976_v8 }
   0xd   :  { %2484 = vmatmul.mubr.f32.vlgmr.msra.gmra.mrb[2].mxu0 %v2889_v3  ;;  %2696 = vmatprep.subr.bf16.mxu0 %v2891_v7 }
   0xe   :  { %2492 = vmatprep.mubr.msk.f32.mxu0 %vm2890_vm1, %v2889_v3  ;;  %2509 = vmatpush3.msk.msra.mxu1 %vm132_vm2, %v2976_v8 }
   0xf   :  { %2705 = vmatprep.subr.bf16.mxu1 %v2891_v7  ;;  %2698 = vmatpush3.bf16.msra.mxu0 %v3008_v26 }
  0x10   :  { %2490 = vmatprep.subr.mxu0 %v2889_v3 }
  0x13   :  { %2491 = vmatpush3.msk.msra.mxu0 %vm132_vm2, %v3015_v27 }
  0x14   :  { %2699 = vmatprep.subr.bf16.mxu0 %v2891_v7 }
  0xda   :  { %v124_v9 = vpop.f32.mrb[0].mxu0 }
  0xdb   :  { %v2476_v10 = vpop.f32.mrb[1].mxu0  ;;  %v2994_v12 = vadd.f32 %v2324_v11, %v124_v9 }
  0xe0   :  { %v202_v13 = vpop.f32.mrb[2].mxu0 }
  0xe1   :  { %v206_v14 = vadd.f32 %v202_v13, %v2994_v12  ;;  %v2485_v15 = vpop.f32.mrb[3].mxu0 }
  0xe3   :  { %2797 = vtanh.f32 %v206_v14 }
  0xed   :  { %v2798_v16 = vpop.eup %2797 }
  0xee   :  { %212 = vrot.lane.b32.xlu0 %v2798_v16, %s2892_s19  ;;  %v208_v17 = vadd.f32 1.0, %v2798_v16 }
  0xf0   :  { %v209_v18 = vmul.f32 0.5, %v208_v17 }
  0xf2   :  { %v210_v21 = vmul.f32 0.0, %v209_v18 }
 0x160   :  { %v213_v19 = vpop.permute.xlu0 %212 }
 0x161   :  { %v215_v20 = vmul.f32 %v213_v19, %v209_v18 }
 0x163   :  { %217 = vrot.lane.b32.xlu0 %v215_v20, %s2893_s20 }
 0x1d5   :  { %v218_v22 = vpop.permute.xlu0 %217 }
 0x1d6   :  { %v2999_v23 = vadd.f32 %v218_v22, %v210_v21 }
 0x1d8   :  { %2799 = vtanh.f32 %v2999_v23  ;;  %v477_v54 = vrot.slane %v2999_v23, 7 }
 0x1e2   :  { %v2800_v28 = vpop.eup %2799 }
 0x1e3   :  { %223 = vrot.lane.b32.xlu1 %v2800_v28, %s2893_s20 }
 0x255   :  { %v224_v29 = vpop.permute.xlu1 %223 }
 0x256   :  { %v226_v30 = vmul.f32 %v224_v29, %v209_v18 }
 0x258   :  { %228 = vrot.lane.b32.xlu1 %v226_v30, %s2894_s26 }
 0x2ca   :  { %v229_v34 = vpop.permute.xlu1 %228 }
 0x2cb   :  { %2493 = vmatmul.mubr.msk.f32.vlgmr.msra.gmra.mrb[4].mxu0 %vm128_vm3, %v229_v34  ;;  %2511 = vmatmul.mubr.msk.f32.vlgmr.msra.gmra.mrb[0].mxu1 %vm128_vm3, %v229_v34 }
 0x2cc   :  { %2701 = vmatpush3.bf16.msra.mxu0 %v3028_v33  ;;  %2501 = vmatprep.mubr.msk.f32.mxu0 %vm2890_vm1, %v2889_v3 }
 0x2cd   :  { %2499 = vmatprep.subr.mxu0 %v2889_v3  ;;  %2707 = vmatpush3.bf16.msra.mxu1 %v3008_v26 }
 0x2ce   :  { %2517 = vmatprep.subr.mxu1 %v2889_v3  ;;  %2519 = vmatprep.mubr.msk.f32.mxu1 %vm2890_vm1, %v2889_v3 }
 0x2d0   :  { %2500 = vmatpush3.msk.msra.mxu0 %vm132_vm2, %v3039_v35 }
 0x2d1   :  { %2711 = vmatprep.subr.bf16.mxu0 %v2891_v7  ;;  %2518 = vmatpush3.msk.msra.mxu1 %vm132_vm2, %v3015_v27 }
 0x2d2   :  { %2708 = vmatprep.subr.bf16.mxu1 %v2891_v7 }
 0x2d3   :  { %2502 = vmatmul.mubr.f32.vlgmr.msra.gmra.mrb[4].mxu0 %v2889_v3 }
 0x2d4   :  { %2713 = vmatpush3.bf16.msra.mxu0 %v2965_v6  ;;  %2537 = vmatprep.mubr.msk.f32.mxu0 %vm2890_vm1, %v2889_v3 }
 0x2d5   :  { %2535 = vmatprep.subr.mxu0 %v2889_v3 }
 0x2d8   :  { %2536 = vmatpush3.msk.msra.mxu0 %vm132_vm2, %v2976_v8 }
 0x2d9   :  { %2714 = vmatprep.subr.bf16.mxu0 %v2891_v7 }
 0x39e   :  { %v465_v36 = vpop.f32.mrb[0].mxu1 }
 0x39f   :  { %v470_v37 = vrot.slane %v465_v36, 7  ;;  %v2512_v38 = vpop.f32.mrb[1].mxu1 }
 0x3a1   :  { %v472_v39 = vadd.f32 %v470_v37, %v2994_v12 }
 0x3a3   :  { %2801 = vtanh.f32 %v472_v39 }
 0x3a6   :  { %v374_v41 = vpop.f32.mrb[4].mxu0 }
 0x3a7   :  { %v2765_v42 = vadd.f32 %v374_v41, %v3063_v40  ;;  %v2503_v43 = vpop.f32.mrb[5].mxu0 }
 0x3a9   :  { %2803 = vtanh.f32 %v2765_v42 }
 0x3ad   :  { %v2802_v44 = vpop.eup %2801 }
 0x3ae   :  { %481 = vrot.lane.b32.xlu0 %v2802_v44, %s2892_s19  ;;  %v474_v46 = vadd.f32 1.0, %v2802_v44 }
 0x3b0   :  { %v475_v47 = vmul.f32 0.5, %v474_v46 }
 0x3b2   :  { %v479_v55 = vmul.f32 %v477_v54, %v475_v47 }
 0x3b3   :  { %v2804_v45 = vpop.eup %2803 }
 0x3b4   :  { %384 = vrot.lane.b32.xlu1 %v2804_v45, %s2892_s19  ;;  %v380_v50 = vadd.f32 1.0, %v2804_v45 }
 0x3b6   :  { %v381_v51 = vmul.f32 0.5, %v380_v50 }
 0x3b8   :  { %v382_v58 = vmul.f32 0.0, %v381_v51 }
 0x420   :  { %v482_v48 = vpop.permute.xlu0 %481 }
 0x421   :  { %v484_v49 = vmul.f32 %v482_v48, %v475_v47 }
 0x423   :  { %486 = vrot.lane.b32.xlu0 %v484_v49, %s2893_s20 }
 0x426   :  { %v385_v52 = vpop.permute.xlu1 %384 }
 0x427   :  { %v387_v53 = vmul.f32 %v385_v52, %v381_v51 }
 0x429   :  { %389 = vrot.lane.b32.xlu1 %v387_v53, %s2893_s20 }
 0x495   :  { %v487_v56 = vpop.permute.xlu0 %486 }
 0x496   :  { %v489_v57 = vadd.f32 %v487_v56, %v479_v55 }
 0x498   :  { %2805 = vtanh.f32 %v489_v57  ;;  %v746_v30 = vrot.slane %v489_v57, 7 }
 0x49b   :  { %v390_v59 = vpop.permute.xlu1 %389 }
 0x49c   :  { %v392_v60 = vadd.f32 %v390_v59, %v382_v58 }
 0x49e   :  { %2807 = vtanh.f32 %v392_v60 }
 0x4a2   :  { %v2806_v61 = vpop.eup %2805 }
 0x4a3   :  { %492 = vrot.lane.b32.xlu0 %v2806_v61, %s2893_s20 }
 0x4a8   :  { %v2808_v62 = vpop.eup %2807 }
 0x4a9   :  { %395 = vrot.lane.b32.xlu1 %v2808_v62, %s2893_s20 }
 0x515   :  { %v493_v63 = vpop.permute.xlu0 %492 }
 0x516   :  { %v495_v0 = vmul.f32 %v493_v63, %v475_v47 }
 0x518   :  { %v497_v1 = vrot.slane %v495_v0, 1 }
 0x51a   :  { %498 = vrot.lane.b32.xlu0 %v497_v1, %s2894_s26 }
 0x51b   :  { %v396_v2 = vpop.permute.xlu1 %395 }
 0x51c   :  { %v398_v4 = vmul.f32 %v396_v2, %v381_v51 }
 0x51e   :  { %573 = vrot.lane.b32.xlu1 %v398_v4, %s2894_s26 }
 0x58c   :  { %v499_v5 = vpop.permute.xlu0 %498 }
 0x58d   :  { %2520 = vmatmul.mubr.msk.f32.vlgmr.msra.gmra.mrb[2].mxu1 %vm128_vm3, %v499_v5  ;;  %2538 = vmatmul.mubr.msk.f32.vlgmr.msra.gmra.mrb[6].mxu0 %vm128_vm3, %v499_v5 }
 0x58e   :  { %2710 = vmatpush3.bf16.msra.mxu1 %v3028_v33  ;;  %2528 = vmatprep.mubr.msk.f32.mxu1 %vm2890_vm1, %v2889_v3 }
 0x58f   :  { %2526 = vmatprep.subr.mxu1 %v2889_v3  ;;  %2716 = vmatpush3.bf16.msra.mxu0 %v3008_v26 }
 0x590   :  { %2544 = vmatprep.subr.mxu0 %v2889_v3  ;;  %2546 = vmatprep.mubr.msk.f32.mxu0 %vm2890_vm1, %v2889_v3  ;;  %v574_v9 = vpop.permute.xlu1 %573 }
 0x592   :  { %2527 = vmatpush3.msk.msra.mxu1 %vm132_vm2, %v3039_v35 }
 0x593   :  { %2720 = vmatprep.subr.bf16.mxu1 %v2891_v7  ;;  %2545 = vmatpush3.msk.msra.mxu0 %vm132_vm2, %v3015_v27 }
 0x594   :  { %2717 = vmatprep.subr.bf16.mxu0 %v2891_v7 }
 0x595   :  { %2529 = vmatmul.mubr.msk.f32.vlgmr.msra.gmra.mrb[2].mxu1 %vm128_vm3, %v574_v9 }
 0x596   :  { %2722 = vmatpush3.bf16.msra.mxu1 %v2965_v6  ;;  %2564 = vmatprep.mubr.msk.f32.mxu1 %vm2890_vm1, %v2889_v3 }
 0x597   :  { %2562 = vmatprep.subr.mxu1 %v2889_v3 }
 0x59a   :  { %2563 = vmatpush3.msk.msra.mxu1 %vm132_vm2, %v2976_v8 }
 0x59b   :  { %2723 = vmatprep.subr.bf16.mxu1 %v2891_v7 }
 0x660   :  { %v734_v10 = vpop.f32.mrb[6].mxu0 }
 0x661   :  { %v739_v11 = vrot.slane %v734_v10, 6  ;;  %v2539_v13 = vpop.f32.mrb[7].mxu0 }
 0x663   :  { %v741_v14 = vadd.f32 %v739_v11, %v2994_v12 }
 0x665   :  { %2809 = vtanh.f32 %v741_v14 }
 0x668   :  { %v643_v15 = vpop.f32.mrb[2].mxu1 }
 0x669   :  { %v2766_v16 = vadd.f32 %v643_v15, %v3063_v40  ;;  %v2530_v17 = vpop.f32.mrb[3].mxu1 }
 0x66b   :  { %2811 = vtanh.f32 %v2766_v16 }
 0x66f   :  { %v2810_v18 = vpop.eup %2809 }
 0x670   :  { %750 = vrot.lane.b32.xlu0 %v2810_v18, %s2892_s19  ;;  %v743_v20 = vadd.f32 1.0, %v2810_v18 }
 0x672   :  { %v744_v21 = vmul.f32 0.5, %v743_v20 }
 0x674   :  { %v748_v31 = vmul.f32 %v746_v30, %v744_v21 }
 0x675   :  { %v2812_v19 = vpop.eup %2811 }
 0x676   :  { %653 = vrot.lane.b32.xlu1 %v2812_v19, %s2892_s19  ;;  %v649_v24 = vadd.f32 1.0, %v2812_v19 }
 0x678   :  { %v650_v25 = vmul.f32 0.5, %v649_v24 }
 0x67a   :  { %v651_v36 = vmul.f32 %v650_v25, %v392_v60 }
 0x6e2   :  { %v751_v22 = vpop.permute.xlu0 %750 }
 0x6e3   :  { %v753_v23 = vmul.f32 %v751_v22, %v744_v21 }
 0x6e5   :  { %755 = vrot.lane.b32.xlu0 %v753_v23, %s2893_s20 }
 0x6e8   :  { %v654_v28 = vpop.permute.xlu1 %653 }
 0x6e9   :  { %v656_v29 = vmul.f32 %v654_v28, %v650_v25 }
 0x6eb   :  { %658 = vrot.lane.b32.xlu1 %v656_v29, %s2893_s20 }
 0x757   :  { %v756_v32 = vpop.permute.xlu0 %755 }
 0x758   :  { %v758_v34 = vadd.f32 %v756_v32, %v748_v31 }
 0x75a   :  { %2813 = vtanh.f32 %v758_v34  ;;  %v1015_v2 = vrot.slane %v758_v34, 7 }
 0x75d   :  { %v659_v37 = vpop.permute.xlu1 %658 }
 0x75e   :  { %v661_v38 = vadd.f32 %v659_v37, %v651_v36 }
 0x760   :  { %2815 = vtanh.f32 %v661_v38 }
 0x764   :  { %v2814_v39 = vpop.eup %2813 }
 0x765   :  { %761 = vrot.lane.b32.xlu0 %v2814_v39, %s2893_s20 }
 0x76a   :  { %v2816_v41 = vpop.eup %2815 }
 0x76b   :  { %664 = vrot.lane.b32.xlu1 %v2816_v41, %s2893_s20 }
 0x7d7   :  { %v762_v42 = vpop.permute.xlu0 %761 }
 0x7d8   :  { %v764_v43 = vmul.f32 %v762_v42, %v744_v21 }
 0x7da   :  { %v766_v44 = vrot.slane %v764_v43, 2 }
 0x7dc   :  { %767 = vrot.lane.b32.xlu0 %v766_v44, %s2894_s26 }
 0x7dd   :  { %v665_v45 = vpop.permute.xlu1 %664 }
 0x7de   :  { %v667_v46 = vmul.f32 %v665_v45, %v650_v25 }
 0x7e0   :  { %842 = vrot.lane.b32.xlu1 %v667_v46, %s2894_s26 }
 0x84e   :  { %v768_v47 = vpop.permute.xlu0 %767 }
 0x84f   :  { %2547 = vmatmul.mubr.msk.f32.vlgmr.msra.gmra.mrb[8].mxu0 %vm128_vm3, %v768_v47  ;;  %2565 = vmatmul.mubr.msk.f32.vlgmr.msra.gmra.mrb[4].mxu1 %vm128_vm3, %v768_v47 }
 0x850   :  { %2719 = vmatpush3.bf16.msra.mxu0 %v3028_v33  ;;  %2555 = vmatprep.mubr.msk.f32.mxu0 %vm2890_vm1, %v2889_v3 }
 0x851   :  { %2553 = vmatprep.subr.mxu0 %v2889_v3  ;;  %2725 = vmatpush3.bf16.msra.mxu1 %v3008_v26 }
 0x852   :  { %2571 = vmatprep.subr.mxu1 %v2889_v3  ;;  %2573 = vmatprep.mubr.msk.f32.mxu1 %vm2890_vm1, %v2889_v3  ;;  %v843_v48 = vpop.permute.xlu1 %842 }
 0x854   :  { %2554 = vmatpush3.msk.msra.mxu0 %vm132_vm2, %v3039_v35 }
 0x855   :  { %2729 = vmatprep.subr.bf16.mxu0 %v2891_v7  ;;  %2572 = vmatpush3.msk.msra.mxu1 %vm132_vm2, %v3015_v27 }
 0x856   :  { %2726 = vmatprep.subr.bf16.mxu1 %v2891_v7 }
 0x857   :  { %2556 = vmatmul.mubr.msk.f32.vlgmr.msra.gmra.mrb[8].mxu0 %vm128_vm3, %v843_v48 }
 0x858   :  { %2731 = vmatpush3.bf16.msra.mxu0 %v2965_v6  ;;  %2591 = vmatprep.mubr.msk.f32.mxu0 %vm2890_vm1, %v2889_v3 }
 0x859   :  { %2589 = vmatprep.subr.mxu0 %v2889_v3 }
 0x85c   :  { %2590 = vmatpush3.msk.msra.mxu0 %vm132_vm2, %v2976_v8 }
 0x85d   :  { %2732 = vmatprep.subr.bf16.mxu0 %v2891_v7 }
 0x922   :  { %v1003_v49 = vpop.f32.mrb[4].mxu1 }
 0x923   :  { %v1008_v50 = vrot.slane %v1003_v49, 5  ;;  %v2566_v51 = vpop.f32.mrb[5].mxu1 }
 0x925   :  { %v1010_v52 = vadd.f32 %v1008_v50, %v2994_v12 }
 0x927   :  { %2817 = vtanh.f32 %v1010_v52 }
 0x92a   :  { %v912_v53 = vpop.f32.mrb[8].mxu0 }
 0x92b   :  { %v2767_v54 = vadd.f32 %v912_v53, %v3063_v40  ;;  %v2557_v55 = vpop.f32.mrb[9].mxu0 }
 0x92d   :  { %2819 = vtanh.f32 %v2767_v54 }
 0x931   :  { %v2818_v56 = vpop.eup %2817 }
 0x932   :  { %1019 = vrot.lane.b32.xlu0 %v2818_v56, %s2892_s19  ;;  %v1012_v58 = vadd.f32 1.0, %v2818_v56 }
 0x934   :  { %v1013_v59 = vmul.f32 0.5, %v1012_v58 }
 0x936   :  { %v1017_v4 = vmul.f32 %v1015_v2, %v1013_v59 }
 0x937   :  { %v2820_v57 = vpop.eup %2819 }
 0x938   :  { %922 = vrot.lane.b32.xlu1 %v2820_v57, %s2892_s19  ;;  %v918_v62 = vadd.f32 1.0, %v2820_v57 }
 0x93a   :  { %v919_v63 = vmul.f32 0.5, %v918_v62 }
 0x93c   :  { %v920_v10 = vmul.f32 %v919_v63, %v661_v38 }
 0x9a4   :  { %v1020_v60 = vpop.permute.xlu0 %1019 }
 0x9a5   :  { %v1022_v61 = vmul.f32 %v1020_v60, %v1013_v59 }
 0x9a7   :  { %1024 = vrot.lane.b32.xlu0 %v1022_v61, %s2893_s20 }
 0x9aa   :  { %v923_v0 = vpop.permute.xlu1 %922 }
 0x9ab   :  { %v925_v1 = vmul.f32 %v923_v0, %v919_v63 }
 0x9ad   :  { %927 = vrot.lane.b32.xlu1 %v925_v1, %s2893_s20 }
 0xa19   :  { %v1025_v5 = vpop.permute.xlu0 %1024 }
 0xa1a   :  { %v1027_v9 = vadd.f32 %v1025_v5, %v1017_v4 }
 0xa1c   :  { %2821 = vtanh.f32 %v1027_v9  ;;  %v1284_v45 = vrot.slane %v1027_v9, 7 }
 0xa1f   :  { %v928_v11 = vpop.permute.xlu1 %927 }
 0xa20   :  { %v930_v13 = vadd.f32 %v928_v11, %v920_v10 }
 0xa22   :  { %2823 = vtanh.f32 %v930_v13 }
 0xa26   :  { %v2822_v14 = vpop.eup %2821 }
 0xa27   :  { %1030 = vrot.lane.b32.xlu0 %v2822_v14, %s2893_s20 }
 0xa2c   :  { %v2824_v15 = vpop.eup %2823 }
 0xa2d   :  { %933 = vrot.lane.b32.xlu1 %v2824_v15, %s2893_s20 }
 0xa99   :  { %v1031_v16 = vpop.permute.xlu0 %1030 }
 0xa9a   :  { %v1033_v17 = vmul.f32 %v1031_v16, %v1013_v59 }
 0xa9c   :  { %v1035_v18 = vrot.slane %v1033_v17, 3 }
 0xa9e   :  { %1036 = vrot.lane.b32.xlu0 %v1035_v18, %s2894_s26 }
 0xa9f   :  { %v934_v19 = vpop.permute.xlu1 %933 }
 0xaa0   :  { %v936_v20 = vmul.f32 %v934_v19, %v919_v63 }
 0xaa2   :  { %1111 = vrot.lane.b32.xlu1 %v936_v20, %s2894_s26 }
 0xb10   :  { %v1037_v21 = vpop.permute.xlu0 %1036 }
 0xb11   :  { %2574 = vmatmul.mubr.msk.f32.vlgmr.msra.gmra.mrb[6].mxu1 %vm128_vm3, %v1037_v21  ;;  %2592 = vmatmul.mubr.msk.f32.vlgmr.msra.gmra.mrb[10].mxu0 %vm128_vm3, %v1037_v21 }
 0xb12   :  { %2728 = vmatpush3.bf16.msra.mxu1 %v3028_v33  ;;  %2582 = vmatprep.mubr.msk.f32.mxu1 %vm2890_vm1, %v2889_v3 }
 0xb13   :  { %2580 = vmatprep.subr.mxu1 %v2889_v3  ;;  %2734 = vmatpush3.bf16.msra.mxu0 %v3008_v26 }
 0xb14   :  { %2598 = vmatprep.subr.mxu0 %v2889_v3  ;;  %2600 = vmatprep.mubr.msk.f32.mxu0 %vm2890_vm1, %v2889_v3  ;;  %v1112_v22 = vpop.permute.xlu1 %1111 }
 0xb16   :  { %2581 = vmatpush3.msk.msra.mxu1 %vm132_vm2, %v3039_v35 }
 0xb17   :  { %2738 = vmatprep.subr.bf16.mxu1 %v2891_v7  ;;  %2599 = vmatpush3.msk.msra.mxu0 %vm132_vm2, %v3015_v27 }
 0xb18   :  { %2735 = vmatprep.subr.bf16.mxu0 %v2891_v7 }
 0xb19   :  { %2583 = vmatmul.mubr.msk.f32.vlgmr.msra.gmra.mrb[6].mxu1 %vm128_vm3, %v1112_v22 }
 0xb1a   :  { %2740 = vmatpush3.bf16.msra.mxu1 %v2965_v6  ;;  %2618 = vmatprep.mubr.msk.f32.mxu1 %vm2890_vm1, %v2889_v3 }
 0xb1b   :  { %2616 = vmatprep.subr.mxu1 %v2889_v3 }
 0xb1e   :  { %2617 = vmatpush3.msk.msra.mxu1 %vm132_vm2, %v2976_v8 }
 0xb1f   :  { %2741 = vmatprep.subr.bf16.mxu1 %v2891_v7 }
 0xbe4   :  { %v1272_v23 = vpop.f32.mrb[10].mxu0 }
 0xbe5   :  { %v1277_v24 = vrot.slane %v1272_v23, 4  ;;  %v2593_v25 = vpop.f32.mrb[11].mxu0 }
 0xbe7   :  { %v1279_v28 = vadd.f32 %v1277_v24, %v2994_v12 }
 0xbe9   :  { %2825 = vtanh.f32 %v1279_v28 }
 0xbec   :  { %v1181_v29 = vpop.f32.mrb[6].mxu1 }
 0xbed   :  { %v2768_v30 = vadd.f32 %v1181_v29, %v3063_v40  ;;  %v2584_v31 = vpop.f32.mrb[7].mxu1 }
 0xbef   :  { %2827 = vtanh.f32 %v2768_v30 }
 0xbf3   :  { %v2826_v32 = vpop.eup %2825 }
 0xbf4   :  { %1288 = vrot.lane.b32.xlu0 %v2826_v32, %s2892_s19  ;;  %v1281_v36 = vadd.f32 1.0, %v2826_v32 }
 0xbf6   :  { %v1282_v37 = vmul.f32 0.5, %v1281_v36 }
 0xbf8   :  { %v1286_v46 = vmul.f32 %v1284_v45, %v1282_v37 }
 0xbf9   :  { %v2828_v34 = vpop.eup %2827 }
 0xbfa   :  { %1191 = vrot.lane.b32.xlu1 %v2828_v34, %s2892_s19  ;;  %v1187_v41 = vadd.f32 1.0, %v2828_v34 }
 0xbfc   :  { %v1188_v42 = vmul.f32 0.5, %v1187_v41 }
 0xbfe   :  { %v1189_v49 = vmul.f32 %v1188_v42, %v930_v13 }
 0xc66   :  { %v1289_v38 = vpop.permute.xlu0 %1288 }
 0xc67   :  { %v1291_v39 = vmul.f32 %v1289_v38, %v1282_v37 }
 0xc69   :  { %1293 = vrot.lane.b32.xlu0 %v1291_v39, %s2893_s20 }
 0xc6c   :  { %v1192_v43 = vpop.permute.xlu1 %1191 }
 0xc6d   :  { %v1194_v44 = vmul.f32 %v1192_v43, %v1188_v42 }
 0xc6f   :  { %1196 = vrot.lane.b32.xlu1 %v1194_v44, %s2893_s20 }
 0xcdb   :  { %v1294_v47 = vpop.permute.xlu0 %1293 }
 0xcdc   :  { %v1296_v48 = vadd.f32 %v1294_v47, %v1286_v46 }
 0xcde   :  { %2829 = vtanh.f32 %v1296_v48  ;;  %v1553_v19 = vrot.slane %v1296_v48, 7 }
 0xce1   :  { %v1197_v50 = vpop.permute.xlu1 %1196 }
 0xce2   :  { %v1199_v51 = vadd.f32 %v1197_v50, %v1189_v49 }
 0xce4   :  { %2831 = vtanh.f32 %v1199_v51 }
 0xce8   :  { %v2830_v52 = vpop.eup %2829 }
 0xce9   :  { %1299 = vrot.lane.b32.xlu0 %v2830_v52, %s2893_s20 }
 0xcee   :  { %v2832_v53 = vpop.eup %2831 }
 0xcef   :  { %1202 = vrot.lane.b32.xlu1 %v2832_v53, %s2893_s20 }
 0xd5b   :  { %v1300_v54 = vpop.permute.xlu0 %1299 }
 0xd5c   :  { %v1302_v55 = vmul.f32 %v1300_v54, %v1282_v37 }
 0xd5e   :  { %v1304_v56 = vrot.slane %v1302_v55, 4 }
 0xd60   :  { %1305 = vrot.lane.b32.xlu0 %v1304_v56, %s2894_s26 }
 0xd61   :  { %v1203_v57 = vpop.permute.xlu1 %1202 }
 0xd62   :  { %v1205_v58 = vmul.f32 %v1203_v57, %v1188_v42 }
 0xd64   :  { %1380 = vrot.lane.b32.xlu1 %v1205_v58, %s2894_s26 }
 0xdd2   :  { %v1306_v59 = vpop.permute.xlu0 %1305 }
 0xdd3   :  { %2601 = vmatmul.mubr.msk.f32.vlgmr.msra.gmra.mrb[12].mxu0 %vm128_vm3, %v1306_v59  ;;  %2619 = vmatmul.mubr.msk.f32.vlgmr.msra.gmra.mrb[8].mxu1 %vm128_vm3, %v1306_v59 }
 0xdd4   :  { %2737 = vmatpush3.bf16.msra.mxu0 %v3028_v33  ;;  %2609 = vmatprep.mubr.msk.f32.mxu0 %vm2890_vm1, %v2889_v3 }
 0xdd5   :  { %2607 = vmatprep.subr.mxu0 %v2889_v3  ;;  %2743 = vmatpush3.bf16.msra.mxu1 %v3008_v26 }
 0xdd6   :  { %2625 = vmatprep.subr.mxu1 %v2889_v3  ;;  %2627 = vmatprep.mubr.msk.f32.mxu1 %vm2890_vm1, %v2889_v3  ;;  %v1381_v60 = vpop.permute.xlu1 %1380 }
 0xdd8   :  { %2608 = vmatpush3.msk.msra.mxu0 %vm132_vm2, %v3039_v35 }
 0xdd9   :  { %2747 = vmatprep.subr.bf16.mxu0 %v2891_v7  ;;  %2626 = vmatpush3.msk.msra.mxu1 %vm132_vm2, %v3015_v27 }
 0xdda   :  { %2744 = vmatprep.subr.bf16.mxu1 %v2891_v7 }
 0xddb   :  { %2610 = vmatmul.mubr.msk.f32.vlgmr.msra.gmra.mrb[12].mxu0 %vm128_vm3, %v1381_v60 }
 0xddc   :  { %2749 = vmatpush3.bf16.msra.mxu0 %v2965_v6  ;;  %2645 = vmatprep.mubr.msk.f32.mxu0 %vm2890_vm1, %v2889_v3 }
 0xddd   :  { %2643 = vmatprep.subr.mxu0 %v2889_v3 }
 0xde0   :  { %2644 = vmatpush3.msk.msra.mxu0 %vm132_vm2, %v2976_v8 }
 0xde1   :  { %2750 = vmatprep.subr.bf16.mxu0 %v2891_v7 }
 0xea6   :  { %v1541_v61 = vpop.f32.mrb[8].mxu1 }
 0xea7   :  { %v1546_v62 = vrot.slane %v1541_v61, 3  ;;  %v2620_v63 = vpop.f32.mrb[9].mxu1 }
 0xea9   :  { %v1548_v0 = vadd.f32 %v1546_v62, %v2994_v12 }
 0xeab   :  { %2833 = vtanh.f32 %v1548_v0 }
 0xeae   :  { %v1450_v1 = vpop.f32.mrb[12].mxu0 }
 0xeaf   :  { %v2769_v2 = vadd.f32 %v1450_v1, %v3063_v40  ;;  %v2611_v4 = vpop.f32.mrb[13].mxu0 }
 0xeb1   :  { %2835 = vtanh.f32 %v2769_v2 }
 0xeb5   :  { %v2834_v5 = vpop.eup %2833 }
 0xeb6   :  { %1557 = vrot.lane.b32.xlu0 %v2834_v5, %s2892_s19  ;;  %v1550_v10 = vadd.f32 1.0, %v2834_v5 }
 0xeb8   :  { %v1551_v11 = vmul.f32 0.5, %v1550_v10 }
 0xeba   :  { %v1555_v20 = vmul.f32 %v1553_v19, %v1551_v11 }
 0xebb   :  { %v2836_v9 = vpop.eup %2835 }
 0xebc   :  { %1460 = vrot.lane.b32.xlu1 %v2836_v9, %s2892_s19  ;;  %v1456_v15 = vadd.f32 1.0, %v2836_v9 }
 0xebe   :  { %v1457_v16 = vmul.f32 0.5, %v1456_v15 }
 0xec0   :  { %v1458_v23 = vmul.f32 %v1457_v16, %v1199_v51 }
 0xf28   :  { %v1558_v13 = vpop.permute.xlu0 %1557 }
 0xf29   :  { %v1560_v14 = vmul.f32 %v1558_v13, %v1551_v11 }
 0xf2b   :  { %1562 = vrot.lane.b32.xlu0 %v1560_v14, %s2893_s20 }
 0xf2e   :  { %v1461_v17 = vpop.permute.xlu1 %1460 }
 0xf2f   :  { %v1463_v18 = vmul.f32 %v1461_v17, %v1457_v16 }
 0xf31   :  { %1465 = vrot.lane.b32.xlu1 %v1463_v18, %s2893_s20 }
 0xf9d   :  { %v1563_v21 = vpop.permute.xlu0 %1562 }
 0xf9e   :  { %v1565_v22 = vadd.f32 %v1563_v21, %v1555_v20 }
 0xfa0   :  { %2837 = vtanh.f32 %v1565_v22  ;;  %v1822_v55 = vrot.slane %v1565_v22, 7 }
 0xfa3   :  { %v1466_v24 = vpop.permute.xlu1 %1465 }
 0xfa4   :  { %v1468_v25 = vadd.f32 %v1466_v24, %v1458_v23 }
 0xfa6   :  { %2839 = vtanh.f32 %v1468_v25 }
 0xfaa   :  { %v2838_v28 = vpop.eup %2837 }
 0xfab   :  { %1568 = vrot.lane.b32.xlu0 %v2838_v28, %s2893_s20 }
 0xfb0   :  { %v2840_v29 = vpop.eup %2839 }
 0xfb1   :  { %1471 = vrot.lane.b32.xlu1 %v2840_v29, %s2893_s20 }
0x101d   :  { %v1569_v30 = vpop.permute.xlu0 %1568 }
0x101e   :  { %v1571_v31 = vmul.f32 %v1569_v30, %v1551_v11 }
0x1020   :  { %v1573_v32 = vrot.slane %v1571_v31, 5 }
0x1022   :  { %1574 = vrot.lane.b32.xlu0 %v1573_v32, %s2894_s26 }
0x1023   :  { %v1472_v34 = vpop.permute.xlu1 %1471 }
0x1024   :  { %v1474_v36 = vmul.f32 %v1472_v34, %v1457_v16 }
0x1026   :  { %1649 = vrot.lane.b32.xlu1 %v1474_v36, %s2894_s26 }
0x1094   :  { %v1575_v37 = vpop.permute.xlu0 %1574 }
0x1095   :  { %2628 = vmatmul.mubr.msk.f32.vlgmr.msra.gmra.mrb[10].mxu1 %vm128_vm3, %v1575_v37  ;;  %2646 = vmatmul.mubr.msk.f32.vlgmr.msra.gmra.mrb[14].mxu0 %vm128_vm3, %v1575_v37 }
0x1096   :  { %2746 = vmatpush3.bf16.msra.mxu1 %v3028_v33  ;;  %2636 = vmatprep.mubr.msk.f32.mxu1 %vm2890_vm1, %v2889_v3 }
0x1097   :  { %2634 = vmatprep.subr.mxu1 %v2889_v3  ;;  %2752 = vmatpush3.bf16.msra.mxu0 %v3008_v26 }
0x1098   :  { %2652 = vmatprep.subr.mxu0 %v2889_v3  ;;  %2654 = vmatprep.mubr.msk.f32.mxu0 %vm2890_vm1, %v2889_v3  ;;  %v1650_v38 = vpop.permute.xlu1 %1649 }
0x109a   :  { %2635 = vmatpush3.msk.msra.mxu1 %vm132_vm2, %v3039_v35 }
0x109b   :  { %2756 = vmatprep.subr.bf16.mxu1 %v2891_v7  ;;  %2653 = vmatpush3.msk.msra.mxu0 %vm132_vm2, %v3015_v27 }
0x109c   :  { %2753 = vmatprep.subr.bf16.mxu0 %v2891_v7 }
0x109d   :  { %2637 = vmatmul.mubr.msk.f32.vlgmr.msra.gmra.mrb[10].mxu1 %vm128_vm3, %v1650_v38 }
0x109e   :  { %2758 = vmatpush3.bf16.msra.mxu1 %v2965_v6  ;;  %2672 = vmatprep.mubr.msk.f32.mxu1 %vm2890_vm1, %v2889_v3 }
0x109f   :  { %2670 = vmatprep.subr.mxu1 %v2889_v3 }
0x10a2   :  { %2671 = vmatpush3.msk.msra.mxu1 %vm132_vm2, %v2976_v8 }
0x10a3   :  { %2759 = vmatprep.subr.bf16.mxu1 %v2891_v7 }
0x1168   :  { %v1810_v39 = vpop.f32.mrb[14].mxu0 }
0x1169   :  { %v1815_v41 = vrot.slane %v1810_v39, 2  ;;  %v2647_v42 = vpop.f32.mrb[15].mxu0 }
0x116b   :  { %v1817_v43 = vadd.f32 %v1815_v41, %v2994_v12 }
0x116d   :  { %2841 = vtanh.f32 %v1817_v43 }
0x1170   :  { %v1719_v44 = vpop.f32.mrb[10].mxu1 }
0x1171   :  { %v2770_v45 = vadd.f32 %v1719_v44, %v3063_v40  ;;  %v2638_v6 = vpop.f32.mrb[11].mxu1 }
0x1173   :  { %2843 = vtanh.f32 %v2770_v45 }
0x1177   :  { %v2842_v46 = vpop.eup %2841 }
0x1178   :  { %1826 = vrot.lane.b32.xlu0 %v2842_v46, %s2892_s19  ;;  %v1819_v8 = vadd.f32 1.0, %v2842_v46 }
0x117a   :  { %v1820_v48 = vmul.f32 0.5, %v1819_v8 }
0x117c   :  { %v1824_v56 = vmul.f32 %v1822_v55, %v1820_v48 }
0x117d   :  { %v2844_v47 = vpop.eup %2843 }
0x117e   :  { %1729 = vrot.lane.b32.xlu1 %v2844_v47, %s2892_s19  ;;  %v1725_v51 = vadd.f32 1.0, %v2844_v47 }
0x1180   :  { %v1726_v52 = vmul.f32 0.5, %v1725_v51 }
0x1182   :  { %v1727_v59 = vmul.f32 %v1726_v52, %v1468_v25 }
0x11ea   :  { %v1827_v49 = vpop.permute.xlu0 %1826 }
0x11eb   :  { %v1829_v50 = vmul.f32 %v1827_v49, %v1820_v48 }
0x11ed   :  { %1831 = vrot.lane.b32.xlu0 %v1829_v50, %s2893_s20 }
0x11f0   :  { %v1730_v53 = vpop.permute.xlu1 %1729 }
0x11f1   :  { %v1732_v54 = vmul.f32 %v1730_v53, %v1726_v52 }
0x11f3   :  { %1734 = vrot.lane.b32.xlu1 %v1732_v54, %s2893_s20 }
0x125f   :  { %v1832_v57 = vpop.permute.xlu0 %1831 }
0x1260   :  { %v1834_v58 = vadd.f32 %v1832_v57, %v1824_v56 }
0x1262   :  { %2845 = vtanh.f32 %v1834_v58  ;;  %v2091_v25 = vrot.slane %v1834_v58, 7 }
0x1265   :  { %v1735_v60 = vpop.permute.xlu1 %1734 }
0x1266   :  { %v1737_v61 = vadd.f32 %v1735_v60, %v1727_v59  ;;  %v2300_v59 = vld [vmem:[#allocation2] sm:$0x1] }
0x1268   :  { %2847 = vtanh.f32 %v1737_v61 }
0x126c   :  { %v2846_v62 = vpop.eup %2845 }
0x126d   :  { %1837 = vrot.lane.b32.xlu0 %v2846_v62, %s2893_s20 }
0x1272   :  { %v2848_v63 = vpop.eup %2847 }
0x1273   :  { %1740 = vrot.lane.b32.xlu1 %v2848_v63, %s2893_s20 }
0x12df   :  { %v1838_v0 = vpop.permute.xlu0 %1837 }
0x12e0   :  { %v1840_v1 = vmul.f32 %v1838_v0, %v1820_v48 }
0x12e2   :  { %v1842_v2 = vrot.slane %v1840_v1, 6 }
0x12e4   :  { %1843 = vrot.lane.b32.xlu0 %v1842_v2, %s2894_s26 }
0x12e5   :  { %v1741_v4 = vpop.permute.xlu1 %1740 }
0x12e6   :  { %v1743_v5 = vmul.f32 %v1741_v4, %v1726_v52 }
0x12e8   :  { %1918 = vrot.lane.b32.xlu1 %v1743_v5, %s2894_s26 }
0x1356   :  { %v1844_v9 = vpop.permute.xlu0 %1843 }
0x1357   :  { %2655 = vmatmul.mubr.msk.f32.vlgmr.msra.gmra.mrb[16].mxu0 %vm128_vm3, %v1844_v9  ;;  %2673 = vmatmul.mubr.msk.f32.vlgmr.msra.gmra.mrb[12].mxu1 %vm128_vm3, %v1844_v9 }
0x1358   :  { %2755 = vmatpush3.bf16.msra.mxu0 %v3028_v33  ;;  %2663 = vmatprep.mubr.msk.f32.mxu0 %vm2890_vm1, %v2889_v3 }
0x1359   :  { %2661 = vmatprep.subr.mxu0 %v2889_v3  ;;  %2761 = vmatpush3.bf16.msra.mxu1 %v3008_v26 }
0x135a   :  { %2679 = vmatprep.subr.mxu1 %v2889_v3  ;;  %2681 = vmatprep.mubr.msk.f32.mxu1 %vm2890_vm1, %v2889_v3  ;;  %v1919_v10 = vpop.permute.xlu1 %1918 }
0x135c   :  { %2662 = vmatpush3.msk.msra.mxu0 %vm132_vm2, %v3039_v35 }
0x135d   :  { %2680 = vmatpush3.msk.msra.mxu1 %vm132_vm2, %v3015_v27 }
0x135e   :  { %2762 = vmatprep.subr.bf16.mxu1 %v2891_v7 }
0x135f   :  { %2664 = vmatmul.mubr.msk.f32.vlgmr.msra.gmra.mrb[16].mxu0 %vm128_vm3, %v1919_v10 }
0x142a   :  { %v2079_v11 = vpop.f32.mrb[12].mxu1 }
0x142b   :  { %v2084_v13 = vrot.slane %v2079_v11, 1  ;;  %v2674_v14 = vpop.f32.mrb[13].mxu1 }
0x142d   :  { %v2086_v26 = vadd.f32 %v2084_v13, %v2994_v12 }
0x142f   :  { %2849 = vtanh.f32 %v2086_v26 }
0x1432   :  { %v1988_v15 = vpop.f32.mrb[16].mxu0 }
0x1433   :  { %v2771_v16 = vadd.f32 %v1988_v15, %v3063_v40  ;;  %v2665_v17 = vpop.f32.mrb[17].mxu0 }
0x1435   :  { %2851 = vtanh.f32 %v2771_v16 }
0x1439   :  { %v2850_v18 = vpop.eup %2849 }
0x143a   :  { %2095 = vrot.lane.b32.xlu0 %v2850_v18, %s2892_s19  ;;  %v2088_v7 = vadd.f32 1.0, %v2850_v18 }
0x143c   :  { %v2089_v19 = vmul.f32 0.5, %v2088_v7 }
0x143e   :  { %v2093_v28 = vmul.f32 %v2091_v25, %v2089_v19 }
0x143f   :  { %v2852_v27 = vpop.eup %2851 }
0x1440   :  { %1998 = vrot.lane.b32.xlu1 %v2852_v27, %s2892_s19  ;;  %v1994_v22 = vadd.f32 1.0, %v2852_v27 }
0x1442   :  { %v1995_v12 = vmul.f32 0.5, %v1994_v22 }
0x1444   :  { %v1996_v31 = vmul.f32 %v1995_v12, %v1737_v61 }
0x14ac   :  { %v2096_v20 = vpop.permute.xlu0 %2095 }
0x14ad   :  { %v2098_v21 = vmul.f32 %v2096_v20, %v2089_v19 }
0x14af   :  { %2100 = vrot.lane.b32.xlu0 %v2098_v21, %s2893_s20 }
0x14b2   :  { %v1999_v23 = vpop.permute.xlu1 %1998 }
0x14b3   :  { %v2001_v24 = vmul.f32 %v1999_v23, %v1995_v12 }
0x14b5   :  { %2003 = vrot.lane.b32.xlu1 %v2001_v24, %s2893_s20 }
0x1521   :  { %v2101_v29 = vpop.permute.xlu0 %2100 }
0x1522   :  { %v2103_v30 = vadd.f32 %v2101_v29, %v2093_v28 }
0x1524   :  { %2853 = vtanh.f32 %v2103_v30 }
0x1527   :  { %v2004_v32 = vpop.permute.xlu1 %2003 }
0x1528   :  { %v2006_v34 = vadd.f32 %v2004_v32, %v1996_v31 }
0x152a   :  { %2855 = vtanh.f32 %v2006_v34 }
0x152e   :  { %v2854_v36 = vpop.eup %2853 }
0x152f   :  { %2106 = vrot.lane.b32.xlu0 %v2854_v36, %s2893_s20 }
0x1534   :  { %v2856_v37 = vpop.eup %2855 }
0x1535   :  { %2009 = vrot.lane.b32.xlu1 %v2856_v37, %s2893_s20 }
0x15a1   :  { %v2107_v38 = vpop.permute.xlu0 %2106 }
0x15a2   :  { %v2109_v39 = vmul.f32 %v2107_v38, %v2089_v19 }
0x15a4   :  { %v2111_v41 = vrot.slane %v2109_v39, 7 }
0x15a6   :  { %2112 = vrot.lane.b32.xlu0 %v2111_v41, %s2894_s26 }
0x15a7   :  { %v2010_v42 = vpop.permute.xlu1 %2009 }
0x15a8   :  { %v2012_v43 = vmul.f32 %v2010_v42, %v1995_v12 }
0x15aa   :  { %2187 = vrot.lane.b32.xlu1 %v2012_v43, %s2894_s26 }
0x1618   :  { %v2113_v44 = vpop.permute.xlu0 %2112 }
0x1619   :  { %2682 = vmatmul.mubr.msk.f32.vlgmr.msra.gmra.mrb[14].mxu1 %vm128_vm3, %v2113_v44 }
0x161a   :  { %2764 = vmatpush3.bf16.msra.mxu1 %v3028_v33  ;;  %2690 = vmatprep.mubr.msk.f32.mxu1 %vm2890_vm1, %v2889_v3 }
0x161b   :  { %2688 = vmatprep.subr.mxu1 %v2889_v3  ;;  %v2372_v3 = vld [vmem:[%s3306_s7] ss:$0 sm:$0xff]  ;;  %s2896_s7 = smov [#allocation3]  }
0x161c   :  { %v2188_v45 = vpop.permute.xlu1 %2187  ;;  %s2316_s14 = sshll.u32 %s2896_s7, 4  ;;  %s2317_s14 = int_to_ptr.vmem [resolvable:$true] %s2316_s14 }
0x161d   :  { %s2865_s15 = scalar_lea.vmem %s2317_s14, 16  ;;  %s2869_s16 = scalar_lea.vmem %s2317_s14, 32 }
0x161e   :  { %2689 = vmatpush3.msk.msra.mxu1 %vm132_vm2, %v3039_v35  ;;  %p2866_p0 = scmp.ne.s32.totalorder %s2317_s14, %s2865_s15  ;;  %p2870_p1 = scmp.lt.s32.totalorder %s2317_s14, %s2317_s14 }
0x161f   :  { %p2871_p2 = scmp.lt.s32.totalorder %s2869_s16, %s2865_s15 }
0x1621   :  { %2691 = vmatmul.mubr.msk.f32.vlgmr.msra.gmra.mrb[14].mxu1 %vm128_vm3, %v2188_v45  ;;  %p2872_p3 = por %p2871_p2, %p2870_p1 }
0x1623   :  { %p2873_p4 = pnand %p2872_p3, %p2866_p0 }
0x16f4   :  { %v2257_v6 = vpop.f32.mrb[14].mxu1 }
0x16f5   :  { %v2772_v46 = vadd.f32 %v2257_v6, %v3063_v40  ;;  %v2692_v47 = vpop.f32.mrb[15].mxu1 }
0x16f7   :  { %2857 = vtanh.f32 %v2772_v46 }
0x1701   :  { %v2858_v8 = vpop.eup %2857 }
0x1702   :  { %2267 = vrot.lane.b32.xlu0 %v2858_v8, %s2892_s19  ;;  %v2263_v33 = vadd.f32 1.0, %v2858_v8 }
0x1704   :  { %v2264_v48 = vmul.f32 0.5, %v2263_v33 }
0x1706   :  { %v2265_v35 = vmul.f32 %v2264_v48, %v2006_v34 }
0x1774   :  { %v2268_v49 = vpop.permute.xlu0 %2267 }
0x1775   :  { %v2270_v50 = vmul.f32 %v2268_v49, %v2264_v48 }
0x1777   :  { %2272 = vrot.lane.b32.xlu1 %v2270_v50, %s2893_s20 }
0x177b   :  { %2288 = vrot.lane.b32.xlu1 %v2372_v3, %s2895_s13 }
0x17e9   :  { %v2273_v51 = vpop.permute.xlu1 %2272 }
0x17ea   :  { %v2275_v40 = vadd.f32 %v2273_v51, %v2265_v35 }
0x17ec   :  { %2859 = vtanh.f32 %v2275_v40 }
0x17ed   :  { %v2289_v54 = vpop.permute.xlu1 %2288 }
0x17f6   :  { %v2860_v52 = vpop.eup %2859 }
0x17f7   :  { %2278 = vrot.lane.b32.xlu0 %v2860_v52, %s2893_s20 }
0x1869   :  { %v2279_v53 = vpop.permute.xlu0 %2278 }
0x186a   :  { %v2281_v55 = vmul.f32 %v2279_v53, %v2264_v48 }
0x186c   :  { %v2291_v56 = vmul.f32 %v2289_v54, %v2281_v55 }
0x186e   :  { %2293 = vrot.lane.b32.xlu0 %v2291_v56, %s2894_s26 }
0x18e0   :  { %v2294_v57 = vpop.permute.xlu0 %2293 }
0x18e1   :  { %v2297_v58 = vsel %vm2296_vm4, %v2294_v57, 0.0 }
0x18e2   :  { %2298 = vadd.xlane.f32.xlu1 %v2297_v58 }
0x196f   :  { %v2299_v60 = vpop.xlane.xlu1 %2298 }
0x1970   :  { %v2301_v61 = vadd.f32 %v2300_v59, %v2299_v60 }
0x1972   :  { %v2373_v62 = vmul.f32 -1.442695, %v2301_v61 }
0x1974   :  { %2861 = vpow2.f32 %v2373_v62 }
0x197e   :  { %v2862_v63 = vpop.eup %2861 }
0x197f   :  { %v2305_v0 = vadd.f32 1.0, %v2862_v63 }
0x1981   :  { %2863 = vrcp.f32 %v2305_v0 }
0x198b   :  { %v2864_v1 = vpop.eup %2863 }
0x198c   :  { %2309 = vst.msk [vmem:[#allocation3] sm:$0x1] %vm2308_vm5, %v2864_v1 }
0x198d   :  { %2876 = shalt.err (!%p2873_p4)
}
0x198e   :  { %s2877_s0 = scalar_lea.hbm %s3308_s9, 16 }
0x198f   :  { %p2878_p5 = scmp.ne.s32.totalorder %s3308_s9, %s2877_s0  ;;  %p2881_p6 = scmp.lt.u32.totalorder %s2877_s0, %s3308_s9 }
0x1991   :  { %p2883_p7 = pnand %p2881_p6, %p2878_p5 }
0x1993   :  { %2886 = shalt.err (!%p2883_p7)
}
0x1994   :  { %2319 = dma.vmem_to_hbm [thread:$0]  %s2317_s14, 16, %s3308_s9, [#allocation4]  }
0x1995   :  { %2887 = dma.done.wait [#allocation4], 16  }
0x1996   :  { %2888 = vsyncadd [#allocation4], 4294967280 }
0x1997   :  { %2323 = vsyncpa [#allocation4], 1 }

</bundles_post_ra>
